<compile_context>
chip_gen: v7x
topology: tpu7x:2x2x1
jax: 0.10.0
libtpu: 0.0.40
codegen_flags: <defaults>
</compile_context>

<pallas_src>
import jax
import jax.numpy as jnp
from jax import lax
from jax.experimental import pallas as pl
from jax.experimental.pallas import tpu as pltpu


def _round_up(x, m):
    return (x + m - 1) // m * m


def conv_block_forward(x_nchw, weight, conv_bias, gamma, beta,
                       running_mean, running_var, *, padding=1, eps=1e-5,
                       row_tile=None):
    N, Cin, H, W = x_nchw.shape
    Cout, Cin2, K, K2 = weight.shape
    assert Cin == Cin2 and K == K2
    assert K == 3 and padding == 1, "kernel written for the ConvBlock default k=3, p=1"
    Ho = H + 2 * padding - K + 1
    Wo = W + 2 * padding - K + 1
    assert Ho % 2 == 0 and Wo % 2 == 0, "maxpool(2,2) needs even conv output dims"
    Hp2, Wp2 = Ho // 2, Wo // 2           # pooled output spatial dims
    P = Hp2 * Wp2                         # pooled pixels per image
    KKC = K * K * Cin                     # im2col contraction size
    KKCp = _round_up(KKC, 128)            # lane-aligned contraction dim
    CO = _round_up(Cout, 128)             # lane-dense (padded) output channels

    Hp, Wp = H + 2 * padding, W + 2 * padding
    Hp_e, Wp_e = Hp + (Hp % 2), Wp + (Wp % 2)   # even padded dims for polyphase split
    HH, WW = Hp_e // 2, Wp_e // 2

    # Pooled-row tile: keep the fused-GEMM M dim (4*row_tile*Wp2) <= 512 and, when
    # possible, leave >=2 grid steps per image so the input DMA pipelines.
    if row_tile is None:
        cands = [d for d in range(1, Hp2 + 1) if Hp2 % d == 0 and 4 * d * Wp2 <= 512]
        multi = [d for d in cands if Hp2 // d >= 2]
        row_tile = max(multi) if multi else (max(cands) if cands else 1)
    assert Hp2 % row_tile == 0
    R = Hp2 // row_tile
    tP = row_tile * Wp2                   # pooled pixels per row tile

    # ---- glue: pad + polyphase-pack the input once (1x traffic, bf16) --------------
    # xq[n, u, hh, ww, v*Cin + c] == xpad[n, 2*hh + u, 2*ww + v, c]
    x = jnp.transpose(x_nchw, (0, 2, 3, 1))                               # NHWC
    xp = jnp.pad(x, ((0, 0),
                     (padding, padding + (Hp_e - Hp)),
                     (padding, padding + (Wp_e - Wp)),
                     (0, 0)))
    xq = xp.reshape(N, HH, 2, WW, 2, Cin)
    xq = jnp.transpose(xq, (0, 2, 1, 3, 4, 5)).reshape(N, 2, HH, WW, 2 * Cin)
    xq = xq.astype(jnp.bfloat16)

    # ---- glue: fold conv bias + eval-mode BN; fold scale into the weight columns ---
    scale = (gamma / jnp.sqrt(running_var + eps)).astype(jnp.float32)
    shift = ((conv_bias - running_mean) * scale + beta).astype(jnp.float32)
    wmat = jnp.transpose(weight, (2, 3, 1, 0)).reshape(KKC, Cout).astype(jnp.float32)
    wmat = wmat * scale[None, :]                                          # fold BN scale
    wmat = jnp.pad(wmat, ((0, KKCp - KKC), (0, CO - Cout))).astype(jnp.bfloat16)
    shift_p = jnp.pad(shift, (0, CO - Cout)).reshape(1, CO)               # f32

    quadrants = ((0, 0), (0, 1), (1, 0), (1, 1))

    def convblock_kernel(x_ref, w_ref, shift_ref, o_ref, patch_ref):
        """One (batch element, pooled-row tile) step of the ConvBlock forward.

        x_ref:     (1, 2, HH, WW, 2*Cin)          bf16  full polyphase-packed padded image
        w_ref:     (KKCp, CO)                     bf16  conv weights * BN scale (zero-padded)
        shift_ref: (1, CO)                        f32   folded BN shift (+conv bias)
        o_ref:     (1, row_tile, Wp2, CO)         bf16  pooled output tile
        patch_ref: (4, row_tile, Wp2, KKCp)       bf16  in-kernel im2col slab (4 pool quadrants)
        """
        r = pl.program_id(1)
        row0 = pl.multiple_of(r * row_tile, row_tile)

        # Zero the slab so the lhs columns [KKC, KKCp) are 0 (never NaN) for the GEMM.
        patch_ref[...] = jnp.zeros_like(patch_ref)

        # ---- in-kernel im2col, bf16 end-to-end, 24 copies (merged dx tap pairs) ----
        for q, (i, j) in enumerate(quadrants):
            for dy in range(K):
                rr = i + dy
                u, ar = rr % 2, rr // 2                 # row parity / polyphase row offset
                rows = pl.ds(row0 + ar, row_tile)
                # merged pair of dx taps sharing polyphase column offset ac == j
                # (both column parities v=0,1 are contiguous in x_ref's last dim and
                #  land in adjacent Cin-wide destination columns)
                t0 = dy * K + (0 if j == 0 else 1)
                patch_ref[q, :, :, t0 * Cin:(t0 + 2) * Cin] = (
                    x_ref[0, u, rows, j:j + Wp2, :])
                # remaining single tap
                sv, sac, st = (0, 1, dy * K + 2) if j == 0 else (1, 0, dy * K)
                patch_ref[q, :, :, st * Cin:(st + 1) * Cin] = (
                    x_ref[0, u, rows, sac:sac + Wp2, sv * Cin:(sv + 1) * Cin])

        # ---- one fused bf16 GEMM over all 4 pool quadrants (MXU, f32 accumulation) -
        lhs = patch_ref[...].reshape(4 * tP, KKCp)
        acc = jnp.dot(lhs, w_ref[...], preferred_element_type=jnp.float32)  # (4*tP, CO)

        # ---- 2x2 max-pool (max over quadrant axis), BN shift, ReLU -----------------
        pooled = jnp.max(acc.reshape(4, tP, CO), axis=0)                    # (tP, CO)
        y = jnp.maximum(pooled + shift_ref[...], 0.0)
        o_ref[...] = y.reshape(1, row_tile, Wp2, CO).astype(o_ref.dtype)

    cost = pl.CostEstimate(
        flops=2 * N * 4 * P * KKCp * CO,
        transcendentals=0,
        bytes_accessed=(xq.size * 2 + wmat.size * 2 + shift_p.size * 4
                        + N * Hp2 * Wp2 * CO * 2),
    )

    out = pl.pallas_call(
        convblock_kernel,
        out_shape=jax.ShapeDtypeStruct((N, Hp2, Wp2, CO), jnp.bfloat16),
        grid_spec=pltpu.PrefetchScalarGridSpec(
            num_scalar_prefetch=0,
            grid=(N, R),
            in_specs=[
                # full padded image per batch element; block index depends only on n,
                # so the input DMA is not re-issued across the row-tile steps.
                pl.BlockSpec((1, 2, HH, WW, 2 * Cin), lambda n, r: (n, 0, 0, 0, 0)),
                pl.BlockSpec((KKCp, CO), lambda n, r: (0, 0)),
                pl.BlockSpec((1, CO), lambda n, r: (0, 0)),
            ],
            out_specs=pl.BlockSpec((1, row_tile, Wp2, CO), lambda n, r: (n, r, 0, 0)),
            scratch_shapes=[pltpu.VMEM((4, row_tile, Wp2, KKCp), jnp.bfloat16)],
        ),
        compiler_params=pltpu.CompilerParams(
            dimension_semantics=("parallel", "arbitrary")),
        cost_estimate=cost,
    )(xq, wmat, shift_p)

    # ---- glue: drop channel padding, cast back, NHWC -> NCHW -----------------------
    out = out[:, :, :, :Cout].astype(x_nchw.dtype)
    return jnp.transpose(out, (0, 3, 1, 2))


def reference_forward(x, weight, conv_bias, gamma, beta, mean, var, *, padding=1, eps=1e-5):
    """Pure-JAX reference (eval-mode ConvBlock) for correctness checking."""
    y = lax.conv_general_dilated(
        x, weight, window_strides=(1, 1),
        padding=[(padding, padding), (padding, padding)],
        dimension_numbers=("NCHW", "OIHW", "NCHW"))
    y = y + conv_bias.reshape(1, -1, 1, 1)
    y = (y - mean.reshape(1, -1, 1, 1)) / jnp.sqrt(var.reshape(1, -1, 1, 1) + eps)
    y = y * gamma.reshape(1, -1, 1, 1) + beta.reshape(1, -1, 1, 1)
    y = jnp.maximum(y, 0.0)
    y = lax.reduce_window(y, -jnp.inf, lax.max, (1, 1, 2, 2), (1, 1, 2, 2), "VALID")
    return y  # Dropout2d is identity in eval mode


if __name__ == "__main__":
    key = jax.random.PRNGKey(0)
    kx, kw, kb, kg, kbe, km, kv = jax.random.split(key, 7)

    N, Cin, H, W = 2, 4, 16, 16
    Cout, K = 8, 3

    x = jax.random.normal(kx, (N, Cin, H, W), jnp.float32)
    fan_in = Cin * K * K
    weight = jax.random.normal(kw, (Cout, Cin, K, K), jnp.float32) * (2.0 / fan_in) ** 0.5
    conv_bias = 0.1 * jax.random.normal(kb, (Cout,), jnp.float32)
    gamma = 1.0 + 0.1 * jax.random.normal(kg, (Cout,), jnp.float32)
    beta = 0.1 * jax.random.normal(kbe, (Cout,), jnp.float32)
    running_mean = 0.1 * jax.random.normal(km, (Cout,), jnp.float32)
    running_var = 1.0 + 0.1 * jax.random.uniform(kv, (Cout,), jnp.float32)

    out = conv_block_forward(x, weight, conv_bias, gamma, beta, running_mean, running_var)
    out = jax.block_until_ready(out)

    ref = reference_forward(x, weight, conv_bias, gamma, beta, running_mean, running_var)
    assert out.shape == (N, Cout, H // 2, W // 2), out.shape
    # bf16 inputs/weights/output with f32 accumulation -> looser tolerance than pure f32
    max_err = float(jnp.max(jnp.abs(out - ref)))
    assert jnp.allclose(out, ref, atol=6e-2, rtol=6e-2), max_err

    print("KERNEL_OK")
</pallas_src>

<mosaic_0001>
module attributes {stable_mosaic.version = 11 : i64} {
  func.func @convblock_kernel(%arg0: i32, %arg1: i32, %arg2: memref<1x2x9x9x8xbf16, #tpu.memory_space<vmem>>, %arg3: memref<128x128xbf16, #tpu.memory_space<vmem>>, %arg4: memref<1x128xf32, #tpu.memory_space<vmem>>, %arg5: memref<1x4x8x128xbf16, #tpu.memory_space<vmem>>, %arg6: memref<4x4x8x128xbf16, #tpu.memory_space<vmem>>) attributes {dimension_semantics = [#tpu.dimension_semantics<parallel>, #tpu.dimension_semantics<arbitrary>], iteration_bounds = array<i64: 2, 2>, scalar_prefetch = 0 : i64, scratch_operands = 1 : i64, tpu.core_type = #tpu.core_type<tc>, window_params = [{transform_indices = @transform_0, window_bounds = array<i64: 1, 2, 9, 9, 8>}, {pipeline_mode = #tpu.pipeline_mode<synchronous>, transform_indices = @transform_1, window_bounds = array<i64: 128, 128>}, {pipeline_mode = #tpu.pipeline_mode<synchronous>, transform_indices = @transform_2, window_bounds = array<i64: 1, 128>}, {transform_indices = @transform_3, window_bounds = array<i64: 1, 4, 8, 128>}]} {
    %c4_i32 = arith.constant 4 : i32
    %0 = arith.muli %arg1, %c4_i32 : i32
    %1 = tpu.assume_multiple %0, 4 : i32
    %cst = arith.constant 0.000000e+00 : bf16
    %2 = vector.broadcast %cst : bf16 to vector<4x4x8x128xbf16>
    %c0 = arith.constant 0 : index
    %c0_0 = arith.constant 0 : index
    %c0_1 = arith.constant 0 : index
    %c0_2 = arith.constant 0 : index
    %3 = vector.load %arg6[%c0, %c0_0, %c0_1, %c0_2] : memref<4x4x8x128xbf16, #tpu.memory_space<vmem>>, vector<4x4x8x128xbf16>
    tpu.vector_store %arg6[%c0, %c0_0, %c0_1, %c0_2], %2 {strides = array<i32>} : memref<4x4x8x128xbf16, #tpu.memory_space<vmem>>, vector<4x4x8x128xbf16>,
    %c0_i32 = arith.constant 0 : i32
    %4 = arith.addi %1, %c0_i32 : i32
    %c0_3 = arith.constant 0 : index
    %c0_4 = arith.constant 0 : index
    %5 = arith.index_cast %4 : i32 to index
    %c0_5 = arith.constant 0 : index
    %c0_6 = arith.constant 0 : index
    %6 = vector.load %arg2[%c0_3, %c0_4, %5, %c0_5, %c0_6] : memref<1x2x9x9x8xbf16, #tpu.memory_space<vmem>>, vector<1x1x4x8x8xbf16>
    %7 = vector.shape_cast %6 : vector<1x1x4x8x8xbf16> to vector<4x8x8xbf16>
    %c0_7 = arith.constant 0 : index
    %c0_8 = arith.constant 0 : index
    %c0_9 = arith.constant 0 : index
    %c0_10 = arith.constant 0 : index
    %8 = vector.load %arg6[%c0_7, %c0_8, %c0_9, %c0_10] : memref<4x4x8x128xbf16, #tpu.memory_space<vmem>>, vector<1x4x8x8xbf16>
    %9 = vector.shape_cast %8 : vector<1x4x8x8xbf16> to vector<4x8x8xbf16>
    %10 = vector.shape_cast %7 : vector<4x8x8xbf16> to vector<1x4x8x8xbf16>
    tpu.vector_store %arg6[%c0_7, %c0_8, %c0_9, %c0_10], %10 {strides = array<i32>} : memref<4x4x8x128xbf16, #tpu.memory_space<vmem>>, vector<1x4x8x8xbf16>,
    %c0_11 = arith.constant 0 : index
    %c0_12 = arith.constant 0 : index
    %11 = arith.index_cast %4 : i32 to index
    %c1 = arith.constant 1 : index
    %c0_13 = arith.constant 0 : index
    %12 = vector.load %arg2[%c0_11, %c0_12, %11, %c1, %c0_13] : memref<1x2x9x9x8xbf16, #tpu.memory_space<vmem>>, vector<1x1x4x8x4xbf16>
    %13 = vector.shape_cast %12 : vector<1x1x4x8x4xbf16> to vector<4x8x4xbf16>
    %c0_14 = arith.constant 0 : index
    %c0_15 = arith.constant 0 : index
    %c0_16 = arith.constant 0 : index
    %c8 = arith.constant 8 : index
    %14 = vector.load %arg6[%c0_14, %c0_15, %c0_16, %c8] : memref<4x4x8x128xbf16, #tpu.memory_space<vmem>>, vector<1x4x8x4xbf16>
    %15 = vector.shape_cast %14 : vector<1x4x8x4xbf16> to vector<4x8x4xbf16>
    %16 = vector.shape_cast %13 : vector<4x8x4xbf16> to vector<1x4x8x4xbf16>
    tpu.vector_store %arg6[%c0_14, %c0_15, %c0_16, %c8], %16 {strides = array<i32>} : memref<4x4x8x128xbf16, #tpu.memory_space<vmem>>, vector<1x4x8x4xbf16>,
    %c0_i32_17 = arith.constant 0 : i32
    %17 = arith.addi %1, %c0_i32_17 : i32
    %c0_18 = arith.constant 0 : index
    %c1_19 = arith.constant 1 : index
    %18 = arith.index_cast %17 : i32 to index
    %c0_20 = arith.constant 0 : index
    %c0_21 = arith.constant 0 : index
    %19 = vector.load %arg2[%c0_18, %c1_19, %18, %c0_20, %c0_21] : memref<1x2x9x9x8xbf16, #tpu.memory_space<vmem>>, vector<1x1x4x8x8xbf16>
    %20 = vector.shape_cast %19 : vector<1x1x4x8x8xbf16> to vector<4x8x8xbf16>
    %c0_22 = arith.constant 0 : index
    %c0_23 = arith.constant 0 : index
    %c0_24 = arith.constant 0 : index
    %c12 = arith.constant 12 : index
    %21 = vector.load %arg6[%c0_22, %c0_23, %c0_24, %c12] : memref<4x4x8x128xbf16, #tpu.memory_space<vmem>>, vector<1x4x8x8xbf16>
    %22 = vector.shape_cast %21 : vector<1x4x8x8xbf16> to vector<4x8x8xbf16>
    %23 = vector.shape_cast %20 : vector<4x8x8xbf16> to vector<1x4x8x8xbf16>
    tpu.vector_store %arg6[%c0_22, %c0_23, %c0_24, %c12], %23 {strides = array<i32>} : memref<4x4x8x128xbf16, #tpu.memory_space<vmem>>, vector<1x4x8x8xbf16>,
    %c0_25 = arith.constant 0 : index
    %c1_26 = arith.constant 1 : index
    %24 = arith.index_cast %17 : i32 to index
    %c1_27 = arith.constant 1 : index
    %c0_28 = arith.constant 0 : index
    %25 = vector.load %arg2[%c0_25, %c1_26, %24, %c1_27, %c0_28] : memref<1x2x9x9x8xbf16, #tpu.memory_space<vmem>>, vector<1x1x4x8x4xbf16>
    %26 = vector.shape_cast %25 : vector<1x1x4x8x4xbf16> to vector<4x8x4xbf16>
    %c0_29 = arith.constant 0 : index
    %c0_30 = arith.constant 0 : index
    %c0_31 = arith.constant 0 : index
    %c20 = arith.constant 20 : index
    %27 = vector.load %arg6[%c0_29, %c0_30, %c0_31, %c20] : memref<4x4x8x128xbf16, #tpu.memory_space<vmem>>, vector<1x4x8x4xbf16>
    %28 = vector.shape_cast %27 : vector<1x4x8x4xbf16> to vector<4x8x4xbf16>
    %29 = vector.shape_cast %26 : vector<4x8x4xbf16> to vector<1x4x8x4xbf16>
    tpu.vector_store %arg6[%c0_29, %c0_30, %c0_31, %c20], %29 {strides = array<i32>} : memref<4x4x8x128xbf16, #tpu.memory_space<vmem>>, vector<1x4x8x4xbf16>,
    %c1_i32 = arith.constant 1 : i32
    %30 = arith.addi %1, %c1_i32 : i32
    %c0_32 = arith.constant 0 : index
    %c0_33 = arith.constant 0 : index
    %31 = arith.index_cast %30 : i32 to index
    %c0_34 = arith.constant 0 : index
    %c0_35 = arith.constant 0 : index
    %32 = vector.load %arg2[%c0_32, %c0_33, %31, %c0_34, %c0_35] : memref<1x2x9x9x8xbf16, #tpu.memory_space<vmem>>, vector<1x1x4x8x8xbf16>
    %33 = vector.shape_cast %32 : vector<1x1x4x8x8xbf16> to vector<4x8x8xbf16>
    %c0_36 = arith.constant 0 : index
    %c0_37 = arith.constant 0 : index
    %c0_38 = arith.constant 0 : index
    %c24 = arith.constant 24 : index
    %34 = vector.load %arg6[%c0_36, %c0_37, %c0_38, %c24] : memref<4x4x8x128xbf16, #tpu.memory_space<vmem>>, vector<1x4x8x8xbf16>
    %35 = vector.shape_cast %34 : vector<1x4x8x8xbf16> to vector<4x8x8xbf16>
    %36 = vector.shape_cast %33 : vector<4x8x8xbf16> to vector<1x4x8x8xbf16>
    tpu.vector_store %arg6[%c0_36, %c0_37, %c0_38, %c24], %36 {strides = array<i32>} : memref<4x4x8x128xbf16, #tpu.memory_space<vmem>>, vector<1x4x8x8xbf16>,
    %c0_39 = arith.constant 0 : index
    %c0_40 = arith.constant 0 : index
    %37 = arith.index_cast %30 : i32 to index
    %c1_41 = arith.constant 1 : index
    %c0_42 = arith.constant 0 : index
    %38 = vector.load %arg2[%c0_39, %c0_40, %37, %c1_41, %c0_42] : memref<1x2x9x9x8xbf16, #tpu.memory_space<vmem>>, vector<1x1x4x8x4xbf16>
    %39 = vector.shape_cast %38 : vector<1x1x4x8x4xbf16> to vector<4x8x4xbf16>
    %c0_43 = arith.constant 0 : index
    %c0_44 = arith.constant 0 : index
    %c0_45 = arith.constant 0 : index
    %c32 = arith.constant 32 : index
    %40 = vector.load %arg6[%c0_43, %c0_44, %c0_45, %c32] : memref<4x4x8x128xbf16, #tpu.memory_space<vmem>>, vector<1x4x8x4xbf16>
    %41 = vector.shape_cast %40 : vector<1x4x8x4xbf16> to vector<4x8x4xbf16>
    %42 = vector.shape_cast %39 : vector<4x8x4xbf16> to vector<1x4x8x4xbf16>
    tpu.vector_store %arg6[%c0_43, %c0_44, %c0_45, %c32], %42 {strides = array<i32>} : memref<4x4x8x128xbf16, #tpu.memory_space<vmem>>, vector<1x4x8x4xbf16>,
    %c0_i32_46 = arith.constant 0 : i32
    %43 = arith.addi %1, %c0_i32_46 : i32
    %c0_47 = arith.constant 0 : index
    %c0_48 = arith.constant 0 : index
    %44 = arith.index_cast %43 : i32 to index
    %c1_49 = arith.constant 1 : index
    %c0_50 = arith.constant 0 : index
    %45 = vector.load %arg2[%c0_47, %c0_48, %44, %c1_49, %c0_50] : memref<1x2x9x9x8xbf16, #tpu.memory_space<vmem>>, vector<1x1x4x8x8xbf16>
    %46 = vector.shape_cast %45 : vector<1x1x4x8x8xbf16> to vector<4x8x8xbf16>
    %c1_51 = arith.constant 1 : index
    %c0_52 = arith.constant 0 : index
    %c0_53 = arith.constant 0 : index
    %c4 = arith.constant 4 : index
    %47 = vector.load %arg6[%c1_51, %c0_52, %c0_53, %c4] : memref<4x4x8x128xbf16, #tpu.memory_space<vmem>>, vector<1x4x8x8xbf16>
    %48 = vector.shape_cast %47 : vector<1x4x8x8xbf16> to vector<4x8x8xbf16>
    %49 = vector.shape_cast %46 : vector<4x8x8xbf16> to vector<1x4x8x8xbf16>
    tpu.vector_store %arg6[%c1_51, %c0_52, %c0_53, %c4], %49 {strides = array<i32>} : memref<4x4x8x128xbf16, #tpu.memory_space<vmem>>, vector<1x4x8x8xbf16>,
    %c0_54 = arith.constant 0 : index
    %c0_55 = arith.constant 0 : index
    %50 = arith.index_cast %43 : i32 to index
    %c0_56 = arith.constant 0 : index
    %c4_57 = arith.constant 4 : index
    %51 = vector.load %arg2[%c0_54, %c0_55, %50, %c0_56, %c4_57] : memref<1x2x9x9x8xbf16, #tpu.memory_space<vmem>>, vector<1x1x4x8x4xbf16>
    %52 = vector.shape_cast %51 : vector<1x1x4x8x4xbf16> to vector<4x8x4xbf16>
    %c1_58 = arith.constant 1 : index
    %c0_59 = arith.constant 0 : index
    %c0_60 = arith.constant 0 : index
    %c0_61 = arith.constant 0 : index
    %53 = vector.load %arg6[%c1_58, %c0_59, %c0_60, %c0_61] : memref<4x4x8x128xbf16, #tpu.memory_space<vmem>>, vector<1x4x8x4xbf16>
    %54 = vector.shape_cast %53 : vector<1x4x8x4xbf16> to vector<4x8x4xbf16>
    %55 = vector.shape_cast %52 : vector<4x8x4xbf16> to vector<1x4x8x4xbf16>
    tpu.vector_store %arg6[%c1_58, %c0_59, %c0_60, %c0_61], %55 {strides = array<i32>} : memref<4x4x8x128xbf16, #tpu.memory_space<vmem>>, vector<1x4x8x4xbf16>,
    %c0_i32_62 = arith.constant 0 : i32
    %56 = arith.addi %1, %c0_i32_62 : i32
    %c0_63 = arith.constant 0 : index
    %c1_64 = arith.constant 1 : index
    %57 = arith.index_cast %56 : i32 to index
    %c1_65 = arith.constant 1 : index
    %c0_66 = arith.constant 0 : index
    %58 = vector.load %arg2[%c0_63, %c1_64, %57, %c1_65, %c0_66] : memref<1x2x9x9x8xbf16, #tpu.memory_space<vmem>>, vector<1x1x4x8x8xbf16>
    %59 = vector.shape_cast %58 : vector<1x1x4x8x8xbf16> to vector<4x8x8xbf16>
    %c1_67 = arith.constant 1 : index
    %c0_68 = arith.constant 0 : index
    %c0_69 = arith.constant 0 : index
    %c16 = arith.constant 16 : index
    %60 = vector.load %arg6[%c1_67, %c0_68, %c0_69, %c16] : memref<4x4x8x128xbf16, #tpu.memory_space<vmem>>, vector<1x4x8x8xbf16>
    %61 = vector.shape_cast %60 : vector<1x4x8x8xbf16> to vector<4x8x8xbf16>
    %62 = vector.shape_cast %59 : vector<4x8x8xbf16> to vector<1x4x8x8xbf16>
    tpu.vector_store %arg6[%c1_67, %c0_68, %c0_69, %c16], %62 {strides = array<i32>} : memref<4x4x8x128xbf16, #tpu.memory_space<vmem>>, vector<1x4x8x8xbf16>,
    %c0_70 = arith.constant 0 : index
    %c1_71 = arith.constant 1 : index
    %63 = arith.index_cast %56 : i32 to index
    %c0_72 = arith.constant 0 : index
    %c4_73 = arith.constant 4 : index
    %64 = vector.load %arg2[%c0_70, %c1_71, %63, %c0_72, %c4_73] : memref<1x2x9x9x8xbf16, #tpu.memory_space<vmem>>, vector<1x1x4x8x4xbf16>
    %65 = vector.shape_cast %64 : vector<1x1x4x8x4xbf16> to vector<4x8x4xbf16>
    %c1_74 = arith.constant 1 : index
    %c0_75 = arith.constant 0 : index
    %c0_76 = arith.constant 0 : index
    %c12_77 = arith.constant 12 : index
    %66 = vector.load %arg6[%c1_74, %c0_75, %c0_76, %c12_77] : memref<4x4x8x128xbf16, #tpu.memory_space<vmem>>, vector<1x4x8x4xbf16>
    %67 = vector.shape_cast %66 : vector<1x4x8x4xbf16> to vector<4x8x4xbf16>
    %68 = vector.shape_cast %65 : vector<4x8x4xbf16> to vector<1x4x8x4xbf16>
    tpu.vector_store %arg6[%c1_74, %c0_75, %c0_76, %c12_77], %68 {strides = array<i32>} : memref<4x4x8x128xbf16, #tpu.memory_space<vmem>>, vector<1x4x8x4xbf16>,
    %c1_i32_78 = arith.constant 1 : i32
    %69 = arith.addi %1, %c1_i32_78 : i32
    %c0_79 = arith.constant 0 : index
    %c0_80 = arith.constant 0 : index
    %70 = arith.index_cast %69 : i32 to index
    %c1_81 = arith.constant 1 : index
    %c0_82 = arith.constant 0 : index
    %71 = vector.load %arg2[%c0_79, %c0_80, %70, %c1_81, %c0_82] : memref<1x2x9x9x8xbf16, #tpu.memory_space<vmem>>, vector<1x1x4x8x8xbf16>
    %72 = vector.shape_cast %71 : vector<1x1x4x8x8xbf16> to vector<4x8x8xbf16>
    %c1_83 = arith.constant 1 : index
    %c0_84 = arith.constant 0 : index
    %c0_85 = arith.constant 0 : index
    %c28 = arith.constant 28 : index
    %73 = vector.load %arg6[%c1_83, %c0_84, %c0_85, %c28] : memref<4x4x8x128xbf16, #tpu.memory_space<vmem>>, vector<1x4x8x8xbf16>
    %74 = vector.shape_cast %73 : vector<1x4x8x8xbf16> to vector<4x8x8xbf16>
    %75 = vector.shape_cast %72 : vector<4x8x8xbf16> to vector<1x4x8x8xbf16>
    tpu.vector_store %arg6[%c1_83, %c0_84, %c0_85, %c28], %75 {strides = array<i32>} : memref<4x4x8x128xbf16, #tpu.memory_space<vmem>>, vector<1x4x8x8xbf16>,
    %c0_86 = arith.constant 0 : index
    %c0_87 = arith.constant 0 : index
    %76 = arith.index_cast %69 : i32 to index
    %c0_88 = arith.constant 0 : index
    %c4_89 = arith.constant 4 : index
    %77 = vector.load %arg2[%c0_86, %c0_87, %76, %c0_88, %c4_89] : memref<1x2x9x9x8xbf16, #tpu.memory_space<vmem>>, vector<1x1x4x8x4xbf16>
    %78 = vector.shape_cast %77 : vector<1x1x4x8x4xbf16> to vector<4x8x4xbf16>
    %c1_90 = arith.constant 1 : index
    %c0_91 = arith.constant 0 : index
    %c0_92 = arith.constant 0 : index
    %c24_93 = arith.constant 24 : index
    %79 = vector.load %arg6[%c1_90, %c0_91, %c0_92, %c24_93] : memref<4x4x8x128xbf16, #tpu.memory_space<vmem>>, vector<1x4x8x4xbf16>
    %80 = vector.shape_cast %79 : vector<1x4x8x4xbf16> to vector<4x8x4xbf16>
    %81 = vector.shape_cast %78 : vector<4x8x4xbf16> to vector<1x4x8x4xbf16>
    tpu.vector_store %arg6[%c1_90, %c0_91, %c0_92, %c24_93], %81 {strides = array<i32>} : memref<4x4x8x128xbf16, #tpu.memory_space<vmem>>, vector<1x4x8x4xbf16>,
    %c0_i32_94 = arith.constant 0 : i32
    %82 = arith.addi %1, %c0_i32_94 : i32
    %c0_95 = arith.constant 0 : index
    %c1_96 = arith.constant 1 : index
    %83 = arith.index_cast %82 : i32 to index
    %c0_97 = arith.constant 0 : index
    %c0_98 = arith.constant 0 : index
    %84 = vector.load %arg2[%c0_95, %c1_96, %83, %c0_97, %c0_98] : memref<1x2x9x9x8xbf16, #tpu.memory_space<vmem>>, vector<1x1x4x8x8xbf16>
    %85 = vector.shape_cast %84 : vector<1x1x4x8x8xbf16> to vector<4x8x8xbf16>
    %c2 = arith.constant 2 : index
    %c0_99 = arith.constant 0 : index
    %c0_100 = arith.constant 0 : index
    %c0_101 = arith.constant 0 : index
    %86 = vector.load %arg6[%c2, %c0_99, %c0_100, %c0_101] : memref<4x4x8x128xbf16, #tpu.memory_space<vmem>>, vector<1x4x8x8xbf16>
    %87 = vector.shape_cast %86 : vector<1x4x8x8xbf16> to vector<4x8x8xbf16>
    %88 = vector.shape_cast %85 : vector<4x8x8xbf16> to vector<1x4x8x8xbf16>
    tpu.vector_store %arg6[%c2, %c0_99, %c0_100, %c0_101], %88 {strides = array<i32>} : memref<4x4x8x128xbf16, #tpu.memory_space<vmem>>, vector<1x4x8x8xbf16>,
    %c0_102 = arith.constant 0 : index
    %c1_103 = arith.constant 1 : index
    %89 = arith.index_cast %82 : i32 to index
    %c1_104 = arith.constant 1 : index
    %c0_105 = arith.constant 0 : index
    %90 = vector.load %arg2[%c0_102, %c1_103, %89, %c1_104, %c0_105] : memref<1x2x9x9x8xbf16, #tpu.memory_space<vmem>>, vector<1x1x4x8x4xbf16>
    %91 = vector.shape_cast %90 : vector<1x1x4x8x4xbf16> to vector<4x8x4xbf16>
    %c2_106 = arith.constant 2 : index
    %c0_107 = arith.constant 0 : index
    %c0_108 = arith.constant 0 : index
    %c8_109 = arith.constant 8 : index
    %92 = vector.load %arg6[%c2_106, %c0_107, %c0_108, %c8_109] : memref<4x4x8x128xbf16, #tpu.memory_space<vmem>>, vector<1x4x8x4xbf16>
    %93 = vector.shape_cast %92 : vector<1x4x8x4xbf16> to vector<4x8x4xbf16>
    %94 = vector.shape_cast %91 : vector<4x8x4xbf16> to vector<1x4x8x4xbf16>
    tpu.vector_store %arg6[%c2_106, %c0_107, %c0_108, %c8_109], %94 {strides = array<i32>} : memref<4x4x8x128xbf16, #tpu.memory_space<vmem>>, vector<1x4x8x4xbf16>,
    %c1_i32_110 = arith.constant 1 : i32
    %95 = arith.addi %1, %c1_i32_110 : i32
    %c0_111 = arith.constant 0 : index
    %c0_112 = arith.constant 0 : index
    %96 = arith.index_cast %95 : i32 to index
    %c0_113 = arith.constant 0 : index
    %c0_114 = arith.constant 0 : index
    %97 = vector.load %arg2[%c0_111, %c0_112, %96, %c0_113, %c0_114] : memref<1x2x9x9x8xbf16, #tpu.memory_space<vmem>>, vector<1x1x4x8x8xbf16>
    %98 = vector.shape_cast %97 : vector<1x1x4x8x8xbf16> to vector<4x8x8xbf16>
    %c2_115 = arith.constant 2 : index
    %c0_116 = arith.constant 0 : index
    %c0_117 = arith.constant 0 : index
    %c12_118 = arith.constant 12 : index
    %99 = vector.load %arg6[%c2_115, %c0_116, %c0_117, %c12_118] : memref<4x4x8x128xbf16, #tpu.memory_space<vmem>>, vector<1x4x8x8xbf16>
    %100 = vector.shape_cast %99 : vector<1x4x8x8xbf16> to vector<4x8x8xbf16>
    %101 = vector.shape_cast %98 : vector<4x8x8xbf16> to vector<1x4x8x8xbf16>
    tpu.vector_store %arg6[%c2_115, %c0_116, %c0_117, %c12_118], %101 {strides = array<i32>} : memref<4x4x8x128xbf16, #tpu.memory_space<vmem>>, vector<1x4x8x8xbf16>,
    %c0_119 = arith.constant 0 : index
    %c0_120 = arith.constant 0 : index
    %102 = arith.index_cast %95 : i32 to index
    %c1_121 = arith.constant 1 : index
    %c0_122 = arith.constant 0 : index
    %103 = vector.load %arg2[%c0_119, %c0_120, %102, %c1_121, %c0_122] : memref<1x2x9x9x8xbf16, #tpu.memory_space<vmem>>, vector<1x1x4x8x4xbf16>
    %104 = vector.shape_cast %103 : vector<1x1x4x8x4xbf16> to vector<4x8x4xbf16>
    %c2_123 = arith.constant 2 : index
    %c0_124 = arith.constant 0 : index
    %c0_125 = arith.constant 0 : index
    %c20_126 = arith.constant 20 : index
    %105 = vector.load %arg6[%c2_123, %c0_124, %c0_125, %c20_126] : memref<4x4x8x128xbf16, #tpu.memory_space<vmem>>, vector<1x4x8x4xbf16>
    %106 = vector.shape_cast %105 : vector<1x4x8x4xbf16> to vector<4x8x4xbf16>
    %107 = vector.shape_cast %104 : vector<4x8x4xbf16> to vector<1x4x8x4xbf16>
    tpu.vector_store %arg6[%c2_123, %c0_124, %c0_125, %c20_126], %107 {strides = array<i32>} : memref<4x4x8x128xbf16, #tpu.memory_space<vmem>>, vector<1x4x8x4xbf16>,
    %c1_i32_127 = arith.constant 1 : i32
    %108 = arith.addi %1, %c1_i32_127 : i32
    %c0_128 = arith.constant 0 : index
    %c1_129 = arith.constant 1 : index
    %109 = arith.index_cast %108 : i32 to index
    %c0_130 = arith.constant 0 : index
    %c0_131 = arith.constant 0 : index
    %110 = vector.load %arg2[%c0_128, %c1_129, %109, %c0_130, %c0_131] : memref<1x2x9x9x8xbf16, #tpu.memory_space<vmem>>, vector<1x1x4x8x8xbf16>
    %111 = vector.shape_cast %110 : vector<1x1x4x8x8xbf16> to vector<4x8x8xbf16>
    %c2_132 = arith.constant 2 : index
    %c0_133 = arith.constant 0 : index
    %c0_134 = arith.constant 0 : index
    %c24_135 = arith.constant 24 : index
    %112 = vector.load %arg6[%c2_132, %c0_133, %c0_134, %c24_135] : memref<4x4x8x128xbf16, #tpu.memory_space<vmem>>, vector<1x4x8x8xbf16>
    %113 = vector.shape_cast %112 : vector<1x4x8x8xbf16> to vector<4x8x8xbf16>
    %114 = vector.shape_cast %111 : vector<4x8x8xbf16> to vector<1x4x8x8xbf16>
    tpu.vector_store %arg6[%c2_132, %c0_133, %c0_134, %c24_135], %114 {strides = array<i32>} : memref<4x4x8x128xbf16, #tpu.memory_space<vmem>>, vector<1x4x8x8xbf16>,
    %c0_136 = arith.constant 0 : index
    %c1_137 = arith.constant 1 : index
    %115 = arith.index_cast %108 : i32 to index
    %c1_138 = arith.constant 1 : index
    %c0_139 = arith.constant 0 : index
    %116 = vector.load %arg2[%c0_136, %c1_137, %115, %c1_138, %c0_139] : memref<1x2x9x9x8xbf16, #tpu.memory_space<vmem>>, vector<1x1x4x8x4xbf16>
    %117 = vector.shape_cast %116 : vector<1x1x4x8x4xbf16> to vector<4x8x4xbf16>
    %c2_140 = arith.constant 2 : index
    %c0_141 = arith.constant 0 : index
    %c0_142 = arith.constant 0 : index
    %c32_143 = arith.constant 32 : index
    %118 = vector.load %arg6[%c2_140, %c0_141, %c0_142, %c32_143] : memref<4x4x8x128xbf16, #tpu.memory_space<vmem>>, vector<1x4x8x4xbf16>
    %119 = vector.shape_cast %118 : vector<1x4x8x4xbf16> to vector<4x8x4xbf16>
    %120 = vector.shape_cast %117 : vector<4x8x4xbf16> to vector<1x4x8x4xbf16>
    tpu.vector_store %arg6[%c2_140, %c0_141, %c0_142, %c32_143], %120 {strides = array<i32>} : memref<4x4x8x128xbf16, #tpu.memory_space<vmem>>, vector<1x4x8x4xbf16>,
    %c0_i32_144 = arith.constant 0 : i32
    %121 = arith.addi %1, %c0_i32_144 : i32
    %c0_145 = arith.constant 0 : index
    %c1_146 = arith.constant 1 : index
    %122 = arith.index_cast %121 : i32 to index
    %c1_147 = arith.constant 1 : index
    %c0_148 = arith.constant 0 : index
    %123 = vector.load %arg2[%c0_145, %c1_146, %122, %c1_147, %c0_148] : memref<1x2x9x9x8xbf16, #tpu.memory_space<vmem>>, vector<1x1x4x8x8xbf16>
    %124 = vector.shape_cast %123 : vector<1x1x4x8x8xbf16> to vector<4x8x8xbf16>
    %c3 = arith.constant 3 : index
    %c0_149 = arith.constant 0 : index
    %c0_150 = arith.constant 0 : index
    %c4_151 = arith.constant 4 : index
    %125 = vector.load %arg6[%c3, %c0_149, %c0_150, %c4_151] : memref<4x4x8x128xbf16, #tpu.memory_space<vmem>>, vector<1x4x8x8xbf16>
    %126 = vector.shape_cast %125 : vector<1x4x8x8xbf16> to vector<4x8x8xbf16>
    %127 = vector.shape_cast %124 : vector<4x8x8xbf16> to vector<1x4x8x8xbf16>
    tpu.vector_store %arg6[%c3, %c0_149, %c0_150, %c4_151], %127 {strides = array<i32>} : memref<4x4x8x128xbf16, #tpu.memory_space<vmem>>, vector<1x4x8x8xbf16>,
    %c0_152 = arith.constant 0 : index
    %c1_153 = arith.constant 1 : index
    %128 = arith.index_cast %121 : i32 to index
    %c0_154 = arith.constant 0 : index
    %c4_155 = arith.constant 4 : index
    %129 = vector.load %arg2[%c0_152, %c1_153, %128, %c0_154, %c4_155] : memref<1x2x9x9x8xbf16, #tpu.memory_space<vmem>>, vector<1x1x4x8x4xbf16>
    %130 = vector.shape_cast %129 : vector<1x1x4x8x4xbf16> to vector<4x8x4xbf16>
    %c3_156 = arith.constant 3 : index
    %c0_157 = arith.constant 0 : index
    %c0_158 = arith.constant 0 : index
    %c0_159 = arith.constant 0 : index
    %131 = vector.load %arg6[%c3_156, %c0_157, %c0_158, %c0_159] : memref<4x4x8x128xbf16, #tpu.memory_space<vmem>>, vector<1x4x8x4xbf16>
    %132 = vector.shape_cast %131 : vector<1x4x8x4xbf16> to vector<4x8x4xbf16>
    %133 = vector.shape_cast %130 : vector<4x8x4xbf16> to vector<1x4x8x4xbf16>
    tpu.vector_store %arg6[%c3_156, %c0_157, %c0_158, %c0_159], %133 {strides = array<i32>} : memref<4x4x8x128xbf16, #tpu.memory_space<vmem>>, vector<1x4x8x4xbf16>,
    %c1_i32_160 = arith.constant 1 : i32
    %134 = arith.addi %1, %c1_i32_160 : i32
    %c0_161 = arith.constant 0 : index
    %c0_162 = arith.constant 0 : index
    %135 = arith.index_cast %134 : i32 to index
    %c1_163 = arith.constant 1 : index
    %c0_164 = arith.constant 0 : index
    %136 = vector.load %arg2[%c0_161, %c0_162, %135, %c1_163, %c0_164] : memref<1x2x9x9x8xbf16, #tpu.memory_space<vmem>>, vector<1x1x4x8x8xbf16>
    %137 = vector.shape_cast %136 : vector<1x1x4x8x8xbf16> to vector<4x8x8xbf16>
    %c3_165 = arith.constant 3 : index
    %c0_166 = arith.constant 0 : index
    %c0_167 = arith.constant 0 : index
    %c16_168 = arith.constant 16 : index
    %138 = vector.load %arg6[%c3_165, %c0_166, %c0_167, %c16_168] : memref<4x4x8x128xbf16, #tpu.memory_space<vmem>>, vector<1x4x8x8xbf16>
    %139 = vector.shape_cast %138 : vector<1x4x8x8xbf16> to vector<4x8x8xbf16>
    %140 = vector.shape_cast %137 : vector<4x8x8xbf16> to vector<1x4x8x8xbf16>
    tpu.vector_store %arg6[%c3_165, %c0_166, %c0_167, %c16_168], %140 {strides = array<i32>} : memref<4x4x8x128xbf16, #tpu.memory_space<vmem>>, vector<1x4x8x8xbf16>,
    %c0_169 = arith.constant 0 : index
    %c0_170 = arith.constant 0 : index
    %141 = arith.index_cast %134 : i32 to index
    %c0_171 = arith.constant 0 : index
    %c4_172 = arith.constant 4 : index
    %142 = vector.load %arg2[%c0_169, %c0_170, %141, %c0_171, %c4_172] : memref<1x2x9x9x8xbf16, #tpu.memory_space<vmem>>, vector<1x1x4x8x4xbf16>
    %143 = vector.shape_cast %142 : vector<1x1x4x8x4xbf16> to vector<4x8x4xbf16>
    %c3_173 = arith.constant 3 : index
    %c0_174 = arith.constant 0 : index
    %c0_175 = arith.constant 0 : index
    %c12_176 = arith.constant 12 : index
    %144 = vector.load %arg6[%c3_173, %c0_174, %c0_175, %c12_176] : memref<4x4x8x128xbf16, #tpu.memory_space<vmem>>, vector<1x4x8x4xbf16>
    %145 = vector.shape_cast %144 : vector<1x4x8x4xbf16> to vector<4x8x4xbf16>
    %146 = vector.shape_cast %143 : vector<4x8x4xbf16> to vector<1x4x8x4xbf16>
    tpu.vector_store %arg6[%c3_173, %c0_174, %c0_175, %c12_176], %146 {strides = array<i32>} : memref<4x4x8x128xbf16, #tpu.memory_space<vmem>>, vector<1x4x8x4xbf16>,
    %c1_i32_177 = arith.constant 1 : i32
    %147 = arith.addi %1, %c1_i32_177 : i32
    %c0_178 = arith.constant 0 : index
    %c1_179 = arith.constant 1 : index
    %148 = arith.index_cast %147 : i32 to index
    %c1_180 = arith.constant 1 : index
    %c0_181 = arith.constant 0 : index
    %149 = vector.load %arg2[%c0_178, %c1_179, %148, %c1_180, %c0_181] : memref<1x2x9x9x8xbf16, #tpu.memory_space<vmem>>, vector<1x1x4x8x8xbf16>
    %150 = vector.shape_cast %149 : vector<1x1x4x8x8xbf16> to vector<4x8x8xbf16>
    %c3_182 = arith.constant 3 : index
    %c0_183 = arith.constant 0 : index
    %c0_184 = arith.constant 0 : index
    %c28_185 = arith.constant 28 : index
    %151 = vector.load %arg6[%c3_182, %c0_183, %c0_184, %c28_185] : memref<4x4x8x128xbf16, #tpu.memory_space<vmem>>, vector<1x4x8x8xbf16>
    %152 = vector.shape_cast %151 : vector<1x4x8x8xbf16> to vector<4x8x8xbf16>
    %153 = vector.shape_cast %150 : vector<4x8x8xbf16> to vector<1x4x8x8xbf16>
    tpu.vector_store %arg6[%c3_182, %c0_183, %c0_184, %c28_185], %153 {strides = array<i32>} : memref<4x4x8x128xbf16, #tpu.memory_space<vmem>>, vector<1x4x8x8xbf16>,
    %c0_186 = arith.constant 0 : index
    %c1_187 = arith.constant 1 : index
    %154 = arith.index_cast %147 : i32 to index
    %c0_188 = arith.constant 0 : index
    %c4_189 = arith.constant 4 : index
    %155 = vector.load %arg2[%c0_186, %c1_187, %154, %c0_188, %c4_189] : memref<1x2x9x9x8xbf16, #tpu.memory_space<vmem>>, vector<1x1x4x8x4xbf16>
    %156 = vector.shape_cast %155 : vector<1x1x4x8x4xbf16> to vector<4x8x4xbf16>
    %c3_190 = arith.constant 3 : index
    %c0_191 = arith.constant 0 : index
    %c0_192 = arith.constant 0 : index
    %c24_193 = arith.constant 24 : index
    %157 = vector.load %arg6[%c3_190, %c0_191, %c0_192, %c24_193] : memref<4x4x8x128xbf16, #tpu.memory_space<vmem>>, vector<1x4x8x4xbf16>
    %158 = vector.shape_cast %157 : vector<1x4x8x4xbf16> to vector<4x8x4xbf16>
    %159 = vector.shape_cast %156 : vector<4x8x4xbf16> to vector<1x4x8x4xbf16>
    tpu.vector_store %arg6[%c3_190, %c0_191, %c0_192, %c24_193], %159 {strides = array<i32>} : memref<4x4x8x128xbf16, #tpu.memory_space<vmem>>, vector<1x4x8x4xbf16>,
    %c0_194 = arith.constant 0 : index
    %c0_195 = arith.constant 0 : index
    %c0_196 = arith.constant 0 : index
    %c0_197 = arith.constant 0 : index
    %160 = vector.load %arg6[%c0_194, %c0_195, %c0_196, %c0_197] : memref<4x4x8x128xbf16, #tpu.memory_space<vmem>>, vector<4x4x8x128xbf16>
    %161 = vector.shape_cast %160 : vector<4x4x8x128xbf16> to vector<128x128xbf16>
    %c0_198 = arith.constant 0 : index
    %c0_199 = arith.constant 0 : index
    %162 = vector.load %arg3[%c0_198, %c0_199] : memref<128x128xbf16, #tpu.memory_space<vmem>>, vector<128x128xbf16>
    %cst_200 = arith.constant dense<0.000000e+00> : vector<128x128xf32>
    %163 = tpu.matmul %161, %162, %cst_200 {dimension_numbers = #tpu.dot_dimension_numbers<[1], [0], [0], [1], [0, 0, 1, 1], [], []>} : vector<128x128xbf16>, vector<128x128xbf16>, vector<128x128xf32> -> vector<128x128xf32>
    %164 = vector.shape_cast %163 : vector<128x128xf32> to vector<4x32x128xf32>
    %cst_201 = arith.constant dense<0xFF800000> : vector<32x128xf32>
    %165 = vector.multi_reduction <maximumf>, %164, %cst_201 [0] : vector<4x32x128xf32> to vector<32x128xf32>
    %c0_202 = arith.constant 0 : index
    %c0_203 = arith.constant 0 : index
    %166 = vector.load %arg4[%c0_202, %c0_203] : memref<1x128xf32, #tpu.memory_space<vmem>>, vector<1x128xf32>
    %167 = vector.broadcast %166 : vector<1x128xf32> to vector<32x128xf32>
    %168 = arith.addf %165, %167 : vector<32x128xf32>
    %cst_204 = arith.constant 0.000000e+00 : f32
    %169 = vector.broadcast %cst_204 : f32 to vector<32x128xf32>
    %170 = arith.maximumf %168, %169 : vector<32x128xf32>
    %171 = vector.shape_cast %170 : vector<32x128xf32> to vector<1x4x8x128xf32>
    %172 = arith.truncf %171 : vector<1x4x8x128xf32> to vector<1x4x8x128xbf16>
    %c0_205 = arith.constant 0 : index
    %c0_206 = arith.constant 0 : index
    %c0_207 = arith.constant 0 : index
    %c0_208 = arith.constant 0 : index
    %173 = vector.load %arg5[%c0_205, %c0_206, %c0_207, %c0_208] : memref<1x4x8x128xbf16, #tpu.memory_space<vmem>>, vector<1x4x8x128xbf16>
    tpu.vector_store %arg5[%c0_205, %c0_206, %c0_207, %c0_208], %172 {strides = array<i32>} : memref<1x4x8x128xbf16, #tpu.memory_space<vmem>>, vector<1x4x8x128xbf16>,
    return
  }
  func.func @transform_0(%arg0: i32, %arg1: i32) -> (i32, i32, i32, i32, i32) {
    %c0_i32 = arith.constant 0 : i32
    %c0_i32_0 = arith.constant 0 : i32
    %c0_i32_1 = arith.constant 0 : i32
    %c0_i32_2 = arith.constant 0 : i32
    %c0_i32_3 = arith.constant 0 : i32
    return %arg0, %c0_i32, %c0_i32_0, %c0_i32_1, %c0_i32_2 : i32, i32, i32, i32, i32
  }
  func.func @transform_1(%arg0: i32, %arg1: i32) -> (i32, i32) {
    %c0_i32 = arith.constant 0 : i32
    %c0_i32_0 = arith.constant 0 : i32
    %c0_i32_1 = arith.constant 0 : i32
    return %c0_i32, %c0_i32_0 : i32, i32
  }
  func.func @transform_2(%arg0: i32, %arg1: i32) -> (i32, i32) {
    %c0_i32 = arith.constant 0 : i32
    %c0_i32_0 = arith.constant 0 : i32
    %c0_i32_1 = arith.constant 0 : i32
    return %c0_i32, %c0_i32_0 : i32, i32
  }
  func.func @transform_3(%arg0: i32, %arg1: i32) -> (i32, i32, i32, i32) {
    %c0_i32 = arith.constant 0 : i32
    %c0_i32_0 = arith.constant 0 : i32
    %c0_i32_1 = arith.constant 0 : i32
    return %arg0, %arg1, %c0_i32, %c0_i32_0 : i32, i32, i32, i32
  }
}

</mosaic_0001>

<bundles_post_ra>
// kernel: tpu_custom_call.1
= control target key start
LH: loop header
LB: loop body
LE: loop exit
PB: predicated region body
PF: predicated region fallthrough
CT: control target
= control target key end

     0   :  { %8 = vsyncpa [#allocation4], 0  ;;  %s2893_s0 = inlined_call_operand.vmem [shape: bf16[2,2,9,9,8], index: 0, kind: input, shape index: {}]   ;;  %s2894_s1 = inlined_call_operand.vmem [shape: bf16[128,128], index: 1, kind: input, shape index: {}]   ;;  %s2895_s2 = inlined_call_operand.vmem [shape: f32[1,128], index: 2, kind: input, shape index: {}]   ;;  %s2896_s3 = inlined_call_operand.hbm [shape: bf16[2,8,8,128], index: 3, kind: output, shape index: {}]  }
   0x1   :  { %10 = vsyncpa [#allocation4 + $0x1], 0  ;;  %s2284_s12 = smov 0   ;;  %s2286_s13 = smov 0  }
   0x2   :  { %s2288_s14 = smov 0   ;;  %s2290_s15 = smov 0  }
   0x3   :  { %s2292_s16 = smov 0   ;;  %s2294_s17 = smov 0  }
   0x4   :  { %s2296_s18 = smov 0   ;;  %s2298_s19 = smov 0  }
   0x5 LB: > { %s1816_s20 = sadd.s32 4294967295, %s2250_s19   ;;  %s1817_s21 = sadd.s32 4294967294, %s2250_s19   ;;  %s2250_s19 = sphi %s2298_s19, %s16_s19   ;;  %s2246_s18 = sphi %s2296_s18, %s2907_s18   ;;  %s2242_s17 = sphi %s2294_s17, %s2906_s17   ;;  %s2238_s16 = sphi %s2292_s16, %s2905_s16   ;;  %s2234_s15 = sphi %s2290_s15, %s2904_s15   ;;  %s2230_s14 = sphi %s2288_s14, %s2903_s14   ;;  %s2226_s13 = sphi %s2286_s13, %s2902_s13   ;;  %s2222_s12 = sphi %s2284_s12, %s2901_s12  }
   0x6   : > { %s25_s22 = sadd.s32 1, %s2242_s17  ;;  %s28_s23 = sadd.s32 1, %s2246_s18 }
   0x7   : > { %p26_p0 = scmp.ge.s32.totalorder %s25_s22, 2  ;;  %p115_p1 = scmp.ne.s32.totalorder %s2230_s14, %s2226_s13 }
   0x8   : > { %p116_p2 = scmp.eq.s32.totalorder %s1816_s20, 3  ;;  %p121_p5 = scmp.ne.s32.totalorder %s2226_s13, %s2222_s12 }
   0x9   : > { %s2909_s22 = smov (%p26_p0, %s25_s22), 0  ;;  %s2911_s23 = smov (!%p26_p0, %s28_s23), %s2246_s18 }
   0xa   : > { %s101_s24 = ssub.s32 %s2242_s17, %s2909_s22  ;;  %p2335_p3 = por %p116_p2, %p115_p1 }
   0xb   : > { %p30_p4 = scmp.ge.s32.totalorder %s2911_s23, 2  ;;  %p122_p6 = scmp.eq.s32.totalorder %s1817_s21, 3 }
   0xc   : > { %p1820_p7 = scmp.ge.s32.totalorder %s2250_s19, 1  ;;  %p154_p9 = scmp.lt.s32.totalorder %s2250_s19, 5 }
   0xd   : > { %s2913_s23 = smov (%p30_p4, %s2911_s23), 0  ;;  %p2344_p8 = por %p122_p6, %p121_p5 }
   0xe   : > { %s100_s27 = ssub.s32 %s2246_s18, %s2913_s23  ;;  %s105_s28 = sadd.s32 1, %s2230_s14 }
   0xf   : > { %s102_s29 = sor.u32 %s101_s24, %s100_s27  ;;  %p155_p10 = pnand %p1820_p7, %p154_p9 }
  0x10   : > { %p103_p11 = scmp.eq.s32.totalorder %s102_s29, 0  ;;  %p178_p12 = scmp.lt.s32.totalorder (!%p155_p10), %s2238_s16, 1  ;;  %vm222_vm0 = vsmask.f32 (!%p155_p10), 3328  ;;  %v2252_v0 = vmov (!%p155_p10), 0   ;;  %vm209_vm3 = vcmask (!%p155_p10), 60416  }
  0x11   : > { %158 = sbr.rel (%p155_p10) target bundleno = 569 (0x239), region = 32  ;;  %s1977_s6 = sshll.u32 (!%p155_p10), %s2234_s15, 5  ;;  %188 = vst [vmem:[#allocation2 + $0x8] sm:$0xf] (!%p155_p10), %v2252_v0  ;;  %186 = vst [vmem:[#allocation2] sm:$0xf] (!%p155_p10), %v2252_v0 }
  0x12   : > { %s2353_s30 = scalar_select %p103_p11, %s2230_s14, %s105_s28  }
  0x13   : > { %187 = vst [vmem:[#allocation2 + $0x4] sm:$0xf] (!%p155_p10), %v2252_v0  ;;  %189 = vst [vmem:[#allocation2 + $0xc] sm:$0xf] (!%p155_p10), %v2252_v0  ;;  %s2253_s11 = smov (!%p155_p10), 12   ;;  %s2254_s20 = smov (!%p155_p10), 8  }
  0x14   : > { %190 = vst [vmem:[#allocation2 + $0x10] sm:$0xf] (!%p155_p10), %v2252_v0  ;;  %191 = vst [vmem:[#allocation2 + $0x14] sm:$0xf] (!%p155_p10), %v2252_v0  ;;  %vm223_vm1 = vsmask.f32 (!%p155_p10), 7440 }
  0x15   : > { %192 = vst [vmem:[#allocation2 + $0x18] sm:$0xf] (!%p155_p10), %v2252_v0  ;;  %193 = vst [vmem:[#allocation2 + $0x1c] sm:$0xf] (!%p155_p10), %v2252_v0  ;;  %s2255_s29 = smov (!%p155_p10), 20   ;;  %s2256_s21 = smov (!%p155_p10), 24  }
  0x16   : > { %194 = vst [vmem:[#allocation2 + $0x20] sm:$0xf] (!%p155_p10), %v2252_v0  ;;  %195 = vst [vmem:[#allocation2 + $0x24] sm:$0xf] (!%p155_p10), %v2252_v0  ;;  %s2259_s8 = smov (!%p155_p10), 124   ;;  %vm293_vm4 = vcmask (!%p155_p10), 93248  }
  0x17   : > { %196 = vst [vmem:[#allocation2 + $0x28] sm:$0xf] (!%p155_p10), %v2252_v0  ;;  %197 = vst [vmem:[#allocation2 + $0x2c] sm:$0xf] (!%p155_p10), %v2252_v0  ;;  %vm321_vm5 = vcmask (!%p155_p10), 158816   ;;  %vm402_vm6 = vcmask (!%p155_p10), 191648  }
  0x18   : > { %s179_s4 = scalar_select %p178_p12, %s2238_s16, 1  ;;  %198 = vst [vmem:[#allocation2 + $0x30] sm:$0xf] %v2252_v0  ;;  %199 = vst [vmem:[#allocation2 + $0x34] sm:$0xf] %v2252_v0  ;;  %vm431_vm7 = vcmask 257216  }
  0x19   : > { %200 = vst [vmem:[#allocation2 + $0x38] sm:$0xf] %v2252_v0  ;;  %201 = vst [vmem:[#allocation2 + $0x3c] sm:$0xf] %v2252_v0  ;;  %vm512_vm8 = vcmask 290048   ;;  %vm594_vm9 = vcmask 93216  }
  0x1a   : > { %s2057_s5 = smul.u32 144, %s179_s4  ;;  %vm2380_vm2 = vmor %vm222_vm0, %vm223_vm1  ;;  %vm619_vm10 = vcmask 27648   ;;  %vm700_vm11 = vcmask 191616   ;;  %vm725_vm12 = vcmask 126048   ;;  %vm806_vm13 = vcmask 290016   ;;  %s1971_s27 = sshll.u32 %s2234_s15, 2 }
  0x1b   : > { %vm831_vm14 = vcmask 224448   ;;  %s1972_s28 = sshll.u32 %s2238_s16, 3 }
  0x1c   : > { %s182_s9 = scalar_lea.vmem %s2893_s0, %s2057_s5  ;;  %s2257_s5 = smov 32  }
  0x1d   : > { %s2361_s10 = scalar_lea.vmem %s182_s9, %s1977_s6  ;;  %s2260_s9 = smov 16  }
  0x1e   : > { %v1829_v1 = vld [vmem:[%s2361_s10 + $0x50] sm:$0xf]  ;;  %v1828_v2 = vld [vmem:[%s2361_s10 + $0x48] sm:$0xf]  ;;  %v1831_v3 = vld [vmem:[%s2361_s10 + $0x60] sm:$0xf]  ;;  %s1722_s4 = sadd.s32 %s1972_s28, %s1971_s27 }
  0x1f   : > { %311 = vrot.lane.b32.xlu1 %v1829_v1, %s2253_s11  ;;  %309 = vrot.lane.b32.xlu0 %v1828_v2, %s2253_s11  ;;  %v1830_v4 = vld [vmem:[%s2361_s10 + $0x58] sm:$0xf]  ;;  %v218_v5 = vld [vmem:[%s2361_s10 + $0x10] sm:$0xf]  ;;  %s1973_s7 = sshll.u32 %s1722_s4, 6 }
  0x20   : > { %v219_v6 = vld [vmem:[%s2361_s10 + $0x14] sm:$0x1]  ;;  %v254_v7 = vshrl.u32 %v218_v5, 16  ;;  %v257_v8 = vshll.u32 %v218_v5, 16  ;;  %v214_v9 = vld [vmem:[%s2361_s10] sm:$0xf] }
  0x21   : > { %v263_v10 = vshll.u32 %v219_v6, 16  ;;  %v215_v11 = vld [vmem:[%s2361_s10 + $0x4] sm:$0x1]  ;;  %v226_v12 = vshrl.u32 %v214_v9, 16  ;;  %v229_v13 = vshll.u32 %v214_v9, 16 }
  0x22   : > { %v256_v14 = vrot.slane %v254_v7, 4  ;;  %v259_v15 = vrot.slane %v257_v8, 5  ;;  %v235_v16 = vshll.u32 %v215_v11, 16  ;;  %v220_v17 = vld [vmem:[%s2361_s10 + $0x18] sm:$0xf] }
  0x23   : > { %315 = vrot.lane.b32.xlu1 %v1831_v3, %s2253_s11  ;;  %313 = vrot.lane.b32.xlu0 %v1830_v4, %s2253_s11  ;;  %v265_v18 = vrot.slane %v263_v10, 5  ;;  %v228_v19 = vrot.slane %v226_v12, 4  ;;  %v231_v20 = vrot.slane %v229_v13, 5  ;;  %v221_v21 = vld [vmem:[%s2361_s10 + $0x1c] sm:$0x1]  ;;  %v268_v22 = vshrl.u32 %v220_v17, 16 }
  0x24   : > { %v260_v23 = vor.u32 %v259_v15, %v256_v14  ;;  %v237_v24 = vrot.slane %v235_v16, 5  ;;  %v271_v25 = vshll.u32 %v220_v17, 16  ;;  %v277_v26 = vshll.u32 %v221_v21, 16  ;;  %v216_v27 = vld [vmem:[%s2361_s10 + $0x8] sm:$0xf]  ;;  %v2140_v10 = vld [vmem:[%s2894_s1] sm:$0xff]  }
  0x25   : > { %v232_v29 = vor.u32 %v231_v20, %v228_v19  ;;  %v270_v30 = vrot.slane %v268_v22, 4  ;;  %v217_v31 = vld [vmem:[%s2361_s10 + $0xc] sm:$0x1]  ;;  %v240_v32 = vshrl.u32 %v216_v27, 16  ;;  %v243_v33 = vshll.u32 %v216_v27, 16  ;;  %2009 = vmatprep.subr.bf16.mxu0 %v2140_v10  ;;  %2041 = vmatprep.subr.bf16.mxu1 %v2140_v10 }
  0x26   : > { %v261_v34 = vrot.slane %v260_v23, 4  ;;  %v273_v35 = vrot.slane %v271_v25, 5  ;;  %v279_v36 = vrot.slane %v277_v26, 5  ;;  %v249_v37 = vshll.u32 %v217_v31, 16  ;;  %v1834_v38 = vld [vmem:[%s2361_s10 + $0x50] sm:$0xf]  ;;  %2010 = vmatpush3.bf16.msra.mxu0 %v2140_v10  ;;  %2049 = vmatpush3.bf16.msra.mxu1 %v2140_v10 }
  0x27   : > { %v233_v39 = vrot.slane %v232_v29, 4  ;;  %v242_v40 = vrot.slane %v240_v32, 4  ;;  %v245_v41 = vrot.slane %v243_v33, 5  ;;  %v1835_v42 = vld [vmem:[%s2361_s10 + $0x54] sm:$0x1]  ;;  %v349_v43 = vshrl.u32 %v1834_v38, 16 }
  0x28   : > { %v266_v44 = vsel %vm2380_vm2, %v261_v34, %v265_v18  ;;  %v274_v45 = vor.u32 %v273_v35, %v270_v30  ;;  %v251_v46 = vrot.slane %v249_v37, 5  ;;  %v352_v47 = vshll.u32 %v1834_v38, 16  ;;  %v1832_v48 = vld [vmem:[%s2361_s10 + $0x48] sm:$0xf]  ;;  %v1833_v49 = vld [vmem:[%s2361_s10 + $0x4c] sm:$0x1] }
  0x29   : > { %285 = vrot.lane.b32.xlu1 %v266_v44, %s2254_s20  ;;  %v238_v50 = vsel %vm2380_vm2, %v233_v39, %v237_v24  ;;  %v246_v51 = vor.u32 %v245_v41, %v242_v40  ;;  %v351_v52 = vrot.slane %v349_v43, 4  ;;  %v358_v53 = vshll.u32 %v1835_v42, 16  ;;  %v1838_v54 = vld [vmem:[%s2361_s10 + $0x60] sm:$0xf]  ;;  %v1839_v59 = vld [vmem:[%s2361_s10 + $0x64] sm:$0x1] }
  0x2a   : > { %281 = vrot.lane.b32.xlu0 %v238_v50, %s2254_s20  ;;  %v275_v55 = vrot.slane %v274_v45, 4  ;;  %v354_v56 = vrot.slane %v352_v47, 5  ;;  %v335_v57 = vshrl.u32 %v1832_v48, 16  ;;  %v338_v58 = vshll.u32 %v1832_v48, 16  ;;  %v1836_v0 = vld [vmem:[%s2361_s10 + $0x58] sm:$0xf] }
  0x2b   : > { %v247_v60 = vrot.slane %v246_v51, 4  ;;  %v360_v61 = vrot.slane %v358_v53, 5  ;;  %v344_v62 = vshll.u32 %v1833_v49, 16  ;;  %v377_v63 = vshrl.u32 %v1838_v54, 16  ;;  %v1837_v5 = vld [vmem:[%s2361_s10 + $0x5c] sm:$0x1] }
  0x2c   : > { %v280_v1 = vsel %vm2380_vm2, %v275_v55, %v279_v36  ;;  %v355_v2 = vor.u32 %v354_v56, %v351_v52  ;;  %v337_v3 = vrot.slane %v335_v57, 4  ;;  %v340_v4 = vrot.slane %v338_v58, 5  ;;  %v2141_v15 = vld [vmem:[%s2894_s1 + $0x8] sm:$0xff]   ;;  %v1848_v19 = vld [vmem:[%s2361_s10 + $0x10] sm:$0xf]  ;;  %v2143_v49 = vld [vmem:[%s2894_s1 + $0x18] sm:$0xff]  }
  0x2d   : > { %287 = vrot.lane.b32.xlu1 %v280_v1, %s2254_s20  ;;  %v252_v6 = vsel %vm2380_vm2, %v247_v60, %v251_v46  ;;  %v346_v7 = vrot.slane %v344_v62, 5  ;;  %v379_v8 = vrot.slane %v377_v63, 4  ;;  %v380_v9 = vshll.u32 %v1838_v54, 16  ;;  %v1849_v23 = vld [vmem:[%s2361_s10 + $0x14] sm:$0x1]  ;;  %2011 = vmatprep.subr.bf16.mxu0 %v2141_v15 }
  0x2e   : > { %283 = vrot.lane.b32.xlu0 %v252_v6, %s2254_s20  ;;  %v356_v11 = vrot.slane %v355_v2, 4  ;;  %v341_v12 = vor.u32 %v340_v4, %v337_v3  ;;  %v386_v13 = vshll.u32 %v1839_v59, 16  ;;  %v363_v14 = vshrl.u32 %v1836_v0, 16  ;;  %v1846_v29 = vld [vmem:[%s2361_s10 + $0x8] sm:$0xf]  ;;  %v2142_v30 = vld [vmem:[%s2894_s1 + $0x10] sm:$0xff]   ;;  %2042 = vmatprep.subr.bf16.mxu1 %v2141_v15 }
  0x2f   : > { %v382_v16 = vrot.slane %v380_v9, 5  ;;  %v366_v17 = vshll.u32 %v1836_v0, 16  ;;  %v372_v18 = vshll.u32 %v1837_v5, 16  ;;  %v459_v27 = vshrl.u32 %v1848_v19, 16  ;;  %v1884_v39 = vld [vmem:[%s2361_s10 + $0x50] sm:$0xf]  ;;  %2012 = vmatpush3.bf16.msra.mxu0 %v2141_v15  ;;  %2050 = vmatpush3.bf16.msra.mxu1 %v2141_v15 }
  0x30   : > { %v361_v20 = vsel %vm2380_vm2, %v356_v11, %v360_v61  ;;  %v342_v21 = vrot.slane %v341_v12, 4  ;;  %v365_v22 = vrot.slane %v363_v14, 4  ;;  %v388_v25 = vrot.slane %v386_v13, 5  ;;  %v1847_v42 = vld [vmem:[%s2361_s10 + $0xc] sm:$0x1]  ;;  %2013 = vmatprep.subr.bf16.mxu0 %v2142_v30  ;;  %2043 = vmatprep.subr.bf16.mxu1 %v2142_v30  ;;  %v2144_v6 = vld [vmem:[%s2894_s1 + $0x20] sm:$0xff]  }
  0x31   : > { %392 = vrot.lane.b32.xlu1 %v361_v20, %s2255_s29  ;;  %v383_v24 = vor.u32 %v382_v16, %v379_v8  ;;  %v368_v26 = vrot.slane %v366_v17, 5  ;;  %v374_v32 = vrot.slane %v372_v18, 5  ;;  %v462_v33 = vshll.u32 %v1848_v19, 16  ;;  %v1882_v48 = vld [vmem:[%s2361_s10 + $0x48] sm:$0xf] }
  0x32   : > { %v347_v31 = vsel %vm2380_vm2, %v342_v21, %v346_v7  ;;  %v445_v34 = vshrl.u32 %v1846_v29, 16  ;;  %v461_v37 = vrot.slane %v459_v27, 4  ;;  %v448_v38 = vshll.u32 %v1846_v29, 16  ;;  %v1843_v50 = vld [vmem:[%s2361_s10 + $0x10] sm:$0xf] }
  0x33   : > { %390 = vrot.lane.b32.xlu0 %v347_v31, %s2255_s29  ;;  %v384_v35 = vrot.slane %v383_v24, 4  ;;  %v369_v36 = vor.u32 %v368_v26, %v365_v22  ;;  %v464_v40 = vrot.slane %v462_v33, 5  ;;  %v468_v41 = vshll.u32 %v1849_v23, 16  ;;  %v1885_v52 = vld [vmem:[%s2361_s10 + $0x54] sm:$0x1]  ;;  %2014 = vmatpush3.bf16.msra.mxu0 %v2142_v30  ;;  %v2145_v26 = vld [vmem:[%s2894_s1 + $0x28] sm:$0xff]  }
  0x34   : > { %v447_v43 = vrot.slane %v445_v34, 4  ;;  %v450_v46 = vrot.slane %v448_v38, 5  ;;  %v868_v47 = vshrl.u32 %v1884_v39, 16  ;;  %v871_v53 = vshll.u32 %v1884_v39, 16  ;;  %v1842_v55 = vld [vmem:[%s2361_s10 + $0x8] sm:$0xf]  ;;  %2015 = vmatprep.subr.bf16.mxu0 %v2143_v49  ;;  %2051 = vmatpush3.bf16.msra.mxu1 %v2142_v30 }
  0x35   : > { %v389_v44 = vsel %vm2380_vm2, %v384_v35, %v388_v25  ;;  %v370_v45 = vrot.slane %v369_v36, 4  ;;  %v465_v51 = vor.u32 %v464_v40, %v461_v37  ;;  %v454_v56 = vshll.u32 %v1847_v42, 16  ;;  %v1852_v59 = vld [vmem:[%s2361_s10 + $0x20] sm:$0xf]  ;;  %v1883_v63 = vld [vmem:[%s2361_s10 + $0x4c] sm:$0x1]  ;;  %2044 = vmatprep.subr.bf16.mxu1 %v2143_v49 }
  0x36   : > { %396 = vrot.lane.b32.xlu1 %v389_v44, %s2255_s29  ;;  %v870_v57 = vrot.slane %v868_v47, 4  ;;  %v854_v58 = vshrl.u32 %v1882_v48, 16  ;;  %v2439_v60 = vrot.slane %v468_v41, 5  ;;  %v451_v61 = vor.u32 %v450_v46, %v447_v43  ;;  %v1845_v1 = vld [vmem:[%s2361_s10 + $0x20] sm:$0xf] }
  0x37   : > { %v375_v54 = vsel %vm2380_vm2, %v370_v45, %v374_v32  ;;  %v873_v62 = vrot.slane %v871_v53, 5  ;;  %v857_v0 = vshll.u32 %v1882_v48, 16  ;;  %v877_v2 = vshll.u32 %v1885_v52, 16  ;;  %v1850_v5 = vld [vmem:[%s2361_s10 + $0x18] sm:$0xf]  ;;  %2016 = vmatpush3.bf16.msra.mxu0 %v2143_v49  ;;  %v2146_v45 = vld [vmem:[%s2894_s1 + $0x30] sm:$0xff]  }
  0x38   : > { %394 = vrot.lane.b32.xlu0 %v375_v54, %s2255_s29  ;;  %v856_v3 = vrot.slane %v854_v58, 4  ;;  %v487_v4 = vshrl.u32 %v1852_v59, 16  ;;  %v466_v7 = vrot.slane %v465_v51, 4  ;;  %v490_v10 = vshll.u32 %v1852_v59, 16  ;;  %v1888_v11 = vld [vmem:[%s2361_s10 + $0x60] sm:$0xf]  ;;  %2017 = vmatprep.subr.bf16.mxu0 %v2144_v6 }
  0x39   : > { %v874_v8 = vor.u32 %v873_v62, %v870_v57  ;;  %v859_v9 = vrot.slane %v857_v0, 5  ;;  %v1844_v12 = vld [vmem:[%s2361_s10 + $0x18] sm:$0xf]  ;;  %v456_v13 = vrot.slane %v454_v56, 5  ;;  %v1853_v14 = vld [vmem:[%s2361_s10 + $0x24] sm:$0x1]  ;;  %2052 = vmatpush3.bf16.msra.mxu1 %v2143_v49 }
  0x3a   : > { %421 = vrot.lane.b32.xlu1 %v1843_v50, %s2256_s21  ;;  %v489_v15 = vrot.slane %v487_v4, 4  ;;  %v452_v16 = vrot.slane %v451_v61, 4  ;;  %v863_v17 = vshll.u32 %v1883_v63, 16  ;;  %v492_v18 = vrot.slane %v490_v10, 5  ;;  %v1851_v19 = vld [vmem:[%s2361_s10 + $0x1c] sm:$0x1]  ;;  %2045 = vmatprep.subr.bf16.mxu1 %v2144_v6 }
  0x3b   : > { %v473_v20 = vshrl.u32 %v1850_v5, 16  ;;  %v879_v21 = vrot.slane %v877_v2, 5  ;;  %v860_v22 = vor.u32 %v859_v9, %v856_v3  ;;  %v476_v23 = vshll.u32 %v1850_v5, 16  ;;  %v1886_v25 = vld [vmem:[%s2361_s10 + $0x58] sm:$0xf]  ;;  %2018 = vmatpush3.bf16.msra.mxu0 %v2144_v6 }
  0x3c   : > { %419 = vrot.lane.b32.xlu0 %v1842_v55, %s2256_s21  ;;  %v896_v24 = vshrl.u32 %v1888_v11, 16  ;;  %v471_v27 = vsel %vm2380_vm2, %v466_v7, %v2439_v60  ;;  %v875_v29 = vrot.slane %v874_v8, 4  ;;  %v496_v30 = vshll.u32 %v1853_v14, 16  ;;  %v1889_v39 = vld [vmem:[%s2361_s10 + $0x64] sm:$0x1]  ;;  %2019 = vmatprep.subr.bf16.mxu0 %v2145_v26  ;;  %v2148_v61 = vld [vmem:[%s2894_s1 + $0x38] sm:$0xff]  }
  0x3d   : > { %v475_v31 = vrot.slane %v473_v20, 4  ;;  %v493_v32 = vor.u32 %v492_v18, %v489_v15  ;;  %v478_v33 = vrot.slane %v476_v23, 5  ;;  %v899_v35 = vshll.u32 %v1888_v11, 16  ;;  %2053 = vmatpush3.bf16.msra.mxu1 %v2144_v6  ;;  %v1887_v48 = vld [vmem:[%s2361_s10 + $0x5c] sm:$0x1] }
  0x3e   : > { %425 = vrot.lane.b32.xlu1 %v1845_v1, %s2256_s21  ;;  %v898_v34 = vrot.slane %v896_v24, 4  ;;  %v457_v36 = vsel %vm2380_vm2, %v452_v16, %v456_v13  ;;  %v865_v37 = vrot.slane %v863_v17, 5  ;;  %v482_v38 = vshll.u32 %v1851_v19, 16  ;;  %2046 = vmatprep.subr.bf16.mxu1 %v2145_v26  ;;  %v1896_v54 = vld [vmem:[%s2361_s10 + $0x10] sm:$0xf] }
  0x3f   : > { %v882_v40 = vshrl.u32 %v1886_v25, 16  ;;  %v861_v41 = vrot.slane %v860_v22, 4  ;;  %v479_v42 = vor.u32 %v478_v33, %v475_v31  ;;  %v901_v43 = vrot.slane %v899_v35, 5  ;;  %2020 = vmatpush3.bf16.msra.mxu0 %v2145_v26  ;;  %v1894_v60 = vld [vmem:[%s2361_s10 + $0x8] sm:$0xf] }
  0x40   : > { %423 = vrot.lane.b32.xlu0 %v1844_v12, %s2256_s21  ;;  %v885_v44 = vshll.u32 %v1886_v25, 16  ;;  %v880_v46 = vsel %vm2380_vm2, %v875_v29, %v879_v21  ;;  %v498_v47 = vrot.slane %v496_v30, 5  ;;  %v494_v50 = vrot.slane %v493_v32, 4  ;;  %2021 = vmatprep.subr.bf16.mxu0 %v2146_v45  ;;  %v519_v5 = vld [vmem:[%s2361_s10 + $0x8] sm:$0xf] }
  0x41   : > { %v884_v49 = vrot.slane %v882_v40, 4  ;;  %v902_v51 = vor.u32 %v901_v43, %v898_v34  ;;  %v905_v52 = vshll.u32 %v1889_v39, 16  ;;  %v484_v55 = vrot.slane %v482_v38, 5  ;;  %2054 = vmatpush3.bf16.msra.mxu1 %v2145_v26  ;;  %v517_v11 = vld [vmem:[%s2361_s10] sm:$0xf] }
  0x42   : > { %502 = vrot.lane.b32.xlu1 %v471_v27, %s2257_s5  ;;  %v887_v53 = vrot.slane %v885_v44, 5  ;;  %v866_v56 = vsel %vm2380_vm2, %v861_v41, %v865_v37  ;;  %v480_v57 = vrot.slane %v479_v42, 4  ;;  %v891_v59 = vshll.u32 %v1887_v48, 16  ;;  %2047 = vmatprep.subr.bf16.mxu1 %v2146_v45  ;;  %v1897_v13 = vld [vmem:[%s2361_s10 + $0x14] sm:$0x1] }
  0x43   : > { %v972_v62 = vshrl.u32 %v1896_v54, 16  ;;  %v975_v63 = vshll.u32 %v1896_v54, 16  ;;  %v499_v0 = vsel %vm2380_vm2, %v494_v50, %v498_v47  ;;  %v903_v1 = vrot.slane %v902_v51, 4  ;;  %2022 = vmatpush3.bf16.msra.mxu0 %v2146_v45  ;;  %v1900_v18 = vld [vmem:[%s2361_s10 + $0x20] sm:$0xf] }
  0x44   : > { %500 = vrot.lane.b32.xlu0 %v457_v36, %s2257_s5  ;;  %v888_v58 = vor.u32 %v887_v53, %v884_v49  ;;  %v907_v2 = vrot.slane %v905_v52, 5  ;;  %v958_v3 = vshrl.u32 %v1894_v60, 16  ;;  %v961_v4 = vshll.u32 %v1894_v60, 16  ;;  %2023 = vmatprep.subr.bf16.mxu0 %v2148_v61  ;;  %v1895_v20 = vld [vmem:[%s2361_s10 + $0xc] sm:$0x1] }
  0x45   : > { %v485_v6 = vsel %vm2380_vm2, %v480_v57, %v484_v55  ;;  %v893_v8 = vrot.slane %v891_v59, 5  ;;  %2055 = vmatpush3.bf16.msra.mxu1 %v2146_v45  ;;  %v974_v9 = vrot.slane %v972_v62, 4  ;;  %v977_v10 = vrot.slane %v975_v63, 5  ;;  %v1891_v23 = vld [vmem:[%s2361_s10 + $0x10] sm:$0xf] }
  0x46   : > { %911 = vrot.lane.b32.xlu1 %v880_v46, %s2254_s20  ;;  %v889_v7 = vrot.slane %v888_v58, 4  ;;  %2048 = vmatprep.subr.bf16.mxu1 %v2148_v61  ;;  %v908_v12 = vsel %vm2380_vm2, %v903_v1, %v907_v2  ;;  %v540_v14 = vshrl.u32 %v519_v5, 16  ;;  %v543_v15 = vshll.u32 %v519_v5, 16  ;;  %v1898_v26 = vld [vmem:[%s2361_s10 + $0x18] sm:$0xf] }
  0x47   : > { %v960_v16 = vrot.slane %v958_v3, 4  ;;  %v963_v17 = vrot.slane %v961_v4, 5  ;;  %2024 = vmatpush3.bf16.msra.mxu0 %v2148_v61  ;;  %v526_v21 = vshrl.u32 %v517_v11, 16  ;;  %v529_v22 = vshll.u32 %v517_v11, 16  ;;  %v520_v27 = vld [vmem:[%s2361_s10 + $0xc] sm:$0x1] }
  0x48   : > { %909 = vrot.lane.b32.xlu0 %v866_v56, %s2254_s20  ;;  %v894_v19 = vsel %vm2380_vm2, %v889_v7, %v893_v8  ;;  %v978_v24 = vor.u32 %v977_v10, %v974_v9  ;;  %v981_v25 = vshll.u32 %v1897_v13, 16  ;;  %v542_v29 = vrot.slane %v540_v14, 4  ;;  %v1890_v33 = vld [vmem:[%s2361_s10 + $0x8] sm:$0xf]  ;;  %v518_v36 = vld [vmem:[%s2361_s10 + $0x4] sm:$0x1] }
  0x49   : > { %2056 = vmatpush3.bf16.msra.mxu1 %v2148_v61  ;;  %v545_v30 = vrot.slane %v543_v15, 5  ;;  %v1000_v31 = vshrl.u32 %v1900_v18, 16  ;;  %v1003_v32 = vshll.u32 %v1900_v18, 16  ;;  %v964_v34 = vor.u32 %v963_v17, %v960_v16  ;;  %v1893_v44 = vld [vmem:[%s2361_s10 + $0x20] sm:$0xf] }
  0x4a   : > { %506 = vrot.lane.b32.xlu1 %v499_v0, %s2257_s5  ;;  %v967_v35 = vshll.u32 %v1895_v20, 16  ;;  %v528_v37 = vrot.slane %v526_v21, 4  ;;  %v531_v38 = vrot.slane %v529_v22, 5  ;;  %v986_v39 = vshrl.u32 %v1898_v26, 16  ;;  %v1901_v46 = vld [vmem:[%s2361_s10 + $0x24] sm:$0x1] }
  0x4b   : > { %v989_v40 = vshll.u32 %v1898_v26, 16  ;;  %v979_v41 = vrot.slane %v978_v24, 4  ;;  %v983_v42 = vrot.slane %v981_v25, 5  ;;  %v549_v43 = vshll.u32 %v520_v27, 16  ;;  %v523_v52 = vld [vmem:[%s2361_s10 + $0x18] sm:$0xf] }
  0x4c   : > { %504 = vrot.lane.b32.xlu0 %v485_v6, %s2257_s5  ;;  %v546_v45 = vor.u32 %v545_v30, %v542_v29  ;;  %v1002_v47 = vrot.slane %v1000_v31, 4  ;;  %v1005_v48 = vrot.slane %v1003_v32, 5  ;;  %v965_v49 = vrot.slane %v964_v34, 4  ;;  %v1892_v53 = vld [vmem:[%s2361_s10 + $0x18] sm:$0xf] }
  0x4d   : > { %v969_v50 = vrot.slane %v967_v35, 5  ;;  %v535_v51 = vshll.u32 %v518_v36, 16  ;;  %v532_v54 = vor.u32 %v531_v38, %v528_v37  ;;  %v1899_v55 = vld [vmem:[%s2361_s10 + $0x1c] sm:$0x1]  ;;  %v988_v56 = vrot.slane %v986_v39, 4 }
  0x4e   : > { %915 = vrot.lane.b32.xlu1 %v908_v12, %s2254_s20  ;;  %v991_v57 = vrot.slane %v989_v40, 5  ;;  %v984_v58 = vsel %vm2380_vm2, %v979_v41, %v983_v42  ;;  %v551_v59 = vrot.slane %v549_v43, 5  ;;  %v1009_v60 = vshll.u32 %v1901_v46, 16  ;;  %v521_v61 = vld [vmem:[%s2361_s10 + $0x10] sm:$0xf] }
  0x4f   : > { %v547_v62 = vrot.slane %v546_v45, 4  ;;  %v1006_v63 = vor.u32 %v1005_v48, %v1002_v47  ;;  %v568_v0 = vshrl.u32 %v523_v52, 16  ;;  %v571_v1 = vshll.u32 %v523_v52, 16  ;;  %v524_v15 = vld [vmem:[%s2361_s10 + $0x1c] sm:$0x1] }
  0x50   : > { %913 = vrot.lane.b32.xlu0 %v894_v19, %s2254_s20  ;;  %v970_v2 = vsel %vm2380_vm2, %v965_v49, %v969_v50  ;;  %v537_v3 = vrot.slane %v535_v51, 5  ;;  %v995_v4 = vshll.u32 %v1899_v55, 16  ;;  %v533_v5 = vrot.slane %v532_v54, 4  ;;  %v522_v20 = vld [vmem:[%s2361_s10 + $0x14] sm:$0x1] }
  0x51   : > { %v992_v6 = vor.u32 %v991_v57, %v988_v56  ;;  %v554_v7 = vshrl.u32 %v521_v61, 16  ;;  %v557_v8 = vshll.u32 %v521_v61, 16  ;;  %v1011_v9 = vrot.slane %v1009_v60, 5  ;;  %v1911_v24 = vld [vmem:[%s2361_s10 + $0x58] sm:$0xf] }
  0x52   : > { %935 = vrot.lane.b32.xlu1 %v1891_v23, %s2253_s11  ;;  %v552_v10 = vsel %vm2380_vm2, %v547_v62, %v551_v59  ;;  %v1007_v11 = vrot.slane %v1006_v63, 4  ;;  %v570_v12 = vrot.slane %v568_v0, 4  ;;  %v573_v13 = vrot.slane %v571_v1, 5  ;;  %v1909_v29 = vld [vmem:[%s2361_s10 + $0x50] sm:$0xf] }
  0x53   : > { %v997_v14 = vrot.slane %v995_v4, 5  ;;  %v538_v16 = vsel %vm2380_vm2, %v533_v5, %v537_v3  ;;  %v993_v17 = vrot.slane %v992_v6, 4  ;;  %v556_v18 = vrot.slane %v554_v7, 4  ;;  %v1906_v32 = vld [vmem:[%s2361_s10 + $0x58] sm:$0xf] }
  0x54   : > { %933 = vrot.lane.b32.xlu0 %v1890_v33, %s2253_s11  ;;  %v559_v19 = vrot.slane %v557_v8, 5  ;;  %v1012_v21 = vsel %vm2380_vm2, %v1007_v11, %v1011_v9  ;;  %v574_v22 = vor.u32 %v573_v13, %v570_v12  ;;  %v577_v23 = vshll.u32 %v524_v15, 16  ;;  %v1905_v37 = vld [vmem:[%s2361_s10 + $0x50] sm:$0xf]  ;;  %v1912_v40 = vld [vmem:[%s2361_s10 + $0x5c] sm:$0x1] }
  0x55   : > { %v998_v25 = vsel %vm2380_vm2, %v993_v17, %v997_v14  ;;  %v563_v27 = vshll.u32 %v522_v20, 16  ;;  %v1079_v30 = vshrl.u32 %v1911_v24, 16  ;;  %v1082_v31 = vshll.u32 %v1911_v24, 16  ;;  %v1856_v43 = vld [vmem:[%s2361_s10 + $0x50] sm:$0xf] }
  0x56   : > { %939 = vrot.lane.b32.xlu1 %v1893_v44, %s2253_s11  ;;  %v560_v26 = vor.u32 %v559_v19, %v556_v18  ;;  %v575_v33 = vrot.slane %v574_v22, 4  ;;  %v579_v34 = vrot.slane %v577_v23, 5  ;;  %v1065_v35 = vshrl.u32 %v1909_v29, 16  ;;  %v1910_v49 = vld [vmem:[%s2361_s10 + $0x54] sm:$0x1] }
  0x57   : > { %v1068_v36 = vshll.u32 %v1909_v29, 16  ;;  %v565_v39 = vrot.slane %v563_v27, 5  ;;  %v1081_v41 = vrot.slane %v1079_v30, 4  ;;  %v1084_v42 = vrot.slane %v1082_v31, 5  ;;  %v1854_v51 = vld [vmem:[%s2361_s10 + $0x48] sm:$0xf] }
  0x58   : > { %937 = vrot.lane.b32.xlu0 %v1892_v53, %s2253_s11  ;;  %s2258_s11 = smov 4   ;;  %v561_v38 = vrot.slane %v560_v26, 4  ;;  %v580_v44 = vsel %vm2380_vm2, %v575_v33, %v579_v34  ;;  %v1067_v45 = vrot.slane %v1065_v35, 4  ;;  %v1088_v48 = vshll.u32 %v1912_v40, 16  ;;  %v600_v54 = vld [vmem:[%s2361_s10 + $0x8] sm:$0xf] }
  0x59   : > { %v1070_v46 = vrot.slane %v1068_v36, 5  ;;  %v647_v50 = vshrl.u32 %v1856_v43, 16  ;;  %v1085_v52 = vor.u32 %v1084_v42, %v1081_v41  ;;  %v650_v53 = vshll.u32 %v1856_v43, 16  ;;  %v1915_v59 = vld [vmem:[%s2361_s10 + $0x68] sm:$0xf] }
  0x5a   : > { %1015 = vrot.lane.b32.xlu1 %v984_v58, %s2255_s29  ;;  %v566_v47 = vsel %vm2380_vm2, %v561_v38, %v565_v39  ;;  %v1074_v56 = vshll.u32 %v1910_v49, 16  ;;  %v633_v57 = vshrl.u32 %v1854_v51, 16  ;;  %v636_v58 = vshll.u32 %v1854_v51, 16  ;;  %v599_v60 = vld [vmem:[%s2361_s10] sm:$0xf] }
  0x5b   : > { %v1071_v55 = vor.u32 %v1070_v46, %v1067_v45  ;;  %v1908_v61 = vld [vmem:[%s2361_s10 + $0x68] sm:$0xf]  ;;  %v1090_v62 = vrot.slane %v1088_v48, 5  ;;  %v649_v63 = vrot.slane %v647_v50, 4  ;;  %v1086_v0 = vrot.slane %v1085_v52, 4 }
  0x5c   : > { %1013 = vrot.lane.b32.xlu0 %v970_v2, %s2255_s29  ;;  %v652_v1 = vrot.slane %v650_v53, 5  ;;  %v1913_v2 = vld [vmem:[%s2361_s10 + $0x60] sm:$0xf]  ;;  %v207_v3 = vld [vmem:[%s2361_s10 + $0x10] sm:$0xf]  ;;  %v1107_v6 = vshrl.u32 %v1915_v59, 16 }
  0x5d   : > { %v1907_v4 = vld [vmem:[%s2361_s10 + $0x60] sm:$0xf]  ;;  %v1857_v5 = vld [vmem:[%s2361_s10 + $0x54] sm:$0x1]  ;;  %v1110_v7 = vshll.u32 %v1915_v59, 16  ;;  %v1072_v9 = vrot.slane %v1071_v55, 4  ;;  %v1091_v18 = vsel %vm2380_vm2, %v1086_v0, %v1090_v62 }
  0x5e   : > { %583 = vrot.lane.b32.xlu1 %v552_v10, %s2258_s11  ;;  %212 = vst.msk [vmem:[#allocation2 + $0x8] sm:$0xf] %vm209_vm3, %v207_v3  ;;  %v205_v8 = vld [vmem:[%s2361_s10] sm:$0xf]  ;;  %v1076_v10 = vrot.slane %v1074_v56, 5  ;;  %v635_v11 = vrot.slane %v633_v57, 4  ;;  %v653_v19 = vor.u32 %v652_v1, %v649_v63 }
  0x5f   : > { %v638_v12 = vrot.slane %v636_v58, 5  ;;  %v1860_v13 = vld [vmem:[%s2361_s10 + $0x60] sm:$0xf]  ;;  %210 = vst.msk [vmem:[#allocation2] sm:$0xf] %vm209_vm3, %v205_v8  ;;  %v1093_v15 = vshrl.u32 %v1913_v2, 16 }
  0x60   : > { %581 = vrot.lane.b32.xlu0 %v538_v16, %s2258_s11  ;;  %v1855_v14 = vld [vmem:[%s2361_s10 + $0x4c] sm:$0x1]  ;;  %v1096_v16 = vshll.u32 %v1913_v2, 16  ;;  %v208_v17 = vld [vmem:[%s2361_s10 + $0x18] sm:$0xf]  ;;  %v656_v20 = vshll.u32 %v1857_v5, 16  ;;  %v1077_v29 = vsel %vm2380_vm2, %v1072_v9, %v1076_v10 }
  0x61   : > { %213 = vst.msk [vmem:[#allocation2 + $0xc] sm:$0xf] %vm209_vm3, %v208_v17  ;;  %v206_v22 = vld [vmem:[%s2361_s10 + $0x8] sm:$0xf]  ;;  %v1916_v23 = vld [vmem:[%s2361_s10 + $0x6c] sm:$0x1]  ;;  %v639_v30 = vor.u32 %v638_v12, %v635_v11 }
  0x62   : > { %1019 = vrot.lane.b32.xlu1 %v1012_v21, %s2255_s29  ;;  %v1858_v21 = vld [vmem:[%s2361_s10 + $0x58] sm:$0xf]  ;;  %v1109_v24 = vrot.slane %v1107_v6, 4  ;;  %v675_v26 = vshrl.u32 %v1860_v13, 16  ;;  %v678_v27 = vshll.u32 %v1860_v13, 16  ;;  %v642_v31 = vshll.u32 %v1855_v14, 16 }
  0x63   : > { %211 = vst.msk [vmem:[#allocation2 + $0x4] sm:$0xf] %vm209_vm3, %v206_v22  ;;  %v1095_v33 = vrot.slane %v1093_v15, 4  ;;  %v1098_v34 = vrot.slane %v1096_v16, 5  ;;  %v661_v35 = vshrl.u32 %v1858_v21, 16  ;;  %v664_v36 = vshll.u32 %v1858_v21, 16 }
  0x64   : > { %1017 = vrot.lane.b32.xlu0 %v998_v25, %s2255_s29  ;;  %v1112_v25 = vrot.slane %v1110_v7, 5  ;;  %v1116_v38 = vshll.u32 %v1916_v23, 16  ;;  %v602_v39 = vld [vmem:[%s2361_s10 + $0x18] sm:$0xf]  ;;  %v654_v40 = vrot.slane %v653_v19, 4  ;;  %v677_v42 = vrot.slane %v675_v26, 4 }
  0x65   : > { %v680_v43 = vrot.slane %v678_v27, 5  ;;  %v1861_v46 = vld [vmem:[%s2361_s10 + $0x64] sm:$0x1]  ;;  %v640_v48 = vrot.slane %v639_v30, 4  ;;  %v1099_v49 = vor.u32 %v1098_v34, %v1095_v33  ;;  %v663_v50 = vrot.slane %v661_v35, 4 }
  0x66   : > { %1042 = vrot.lane.b32.xlu1 %v1906_v32, %s2256_s21  ;;  %v1914_v32 = vld [vmem:[%s2361_s10 + $0x64] sm:$0x1]  ;;  %v1113_v41 = vor.u32 %v1112_v25, %v1109_v24  ;;  %v666_v51 = vrot.slane %v664_v36, 5  ;;  %v1118_v52 = vrot.slane %v1116_v38, 5  ;;  %v1859_v53 = vld [vmem:[%s2361_s10 + $0x5c] sm:$0x1] }
  0x67   : > { %v1102_v45 = vshll.u32 %v1914_v32, 16  ;;  %v681_v56 = vor.u32 %v680_v43, %v677_v42  ;;  %v684_v57 = vshll.u32 %v1861_v46, 16  ;;  %v1868_v58 = vld [vmem:[%s2361_s10 + $0x10] sm:$0xf]  ;;  %v1866_v59 = vld [vmem:[%s2361_s10 + $0x8] sm:$0xf] }
  0x68   : > { %1040 = vrot.lane.b32.xlu0 %v1905_v37, %s2256_s21  ;;  %v658_v37 = vrot.slane %v656_v20, 5  ;;  %v1114_v55 = vrot.slane %v1113_v41, 4  ;;  %v1100_v62 = vrot.slane %v1099_v49, 4  ;;  %v667_v63 = vor.u32 %v666_v51, %v663_v50  ;;  %v1919_v8 = vld [vmem:[%s2361_s10 + $0x50] sm:$0xf] }
  0x69   : > { %v670_v0 = vshll.u32 %v1859_v53, 16  ;;  %v753_v1 = vshrl.u32 %v1868_v58, 16  ;;  %v756_v2 = vshll.u32 %v1868_v58, 16  ;;  %v739_v3 = vshrl.u32 %v1866_v59, 16  ;;  %v1879_v9 = vld [vmem:[%s2361_s10 + $0x50] sm:$0xf] }
  0x6a   : > { %587 = vrot.lane.b32.xlu1 %v580_v44, %s2258_s11  ;;  %v644_v44 = vrot.slane %v642_v31, 5  ;;  %v682_v5 = vrot.slane %v681_v56, 4  ;;  %v686_v6 = vrot.slane %v684_v57, 5  ;;  %v742_v7 = vshll.u32 %v1866_v59, 16  ;;  %842 = vst.msk [vmem:[#allocation2 + $0x24] sm:$0xf] %vm209_vm3, %v1879_v9 }
  0x6b   : > { %v668_v11 = vrot.slane %v667_v63, 4  ;;  %v672_v12 = vrot.slane %v670_v0, 5  ;;  %v1878_v13 = vld [vmem:[%s2361_s10 + $0x48] sm:$0xf]  ;;  %v755_v14 = vrot.slane %v753_v1, 4  ;;  %v758_v15 = vrot.slane %v756_v2, 5 }
  0x6c   : > { %585 = vrot.lane.b32.xlu0 %v566_v47, %s2258_s11  ;;  %v601_v47 = vld [vmem:[%s2361_s10 + $0x10] sm:$0xf]  ;;  %v741_v16 = vrot.slane %v739_v3, 4  ;;  %v1917_v17 = vld [vmem:[%s2361_s10 + $0x48] sm:$0xf]  ;;  %v744_v20 = vrot.slane %v742_v7, 5 }
  0x6d   : > { %841 = vst.msk [vmem:[#allocation2 + $0x20] sm:$0xf] %vm209_vm3, %v1878_v13  ;;  %v1869_v19 = vld [vmem:[%s2361_s10 + $0x14] sm:$0x1]  ;;  %v1159_v21 = vshrl.u32 %v1919_v8, 16  ;;  %v1162_v22 = vshll.u32 %v1919_v8, 16  ;;  %v673_v25 = vsel %vm2380_vm2, %v668_v11, %v672_v12  ;;  %v759_v32 = vor.u32 %v758_v15, %v755_v14 }
  0x6e   : > { %609 = vrot.lane.b32.xlu1 %v600_v54, %s2259_s8  ;;  %v659_v54 = vsel %vm2380_vm2, %v654_v40, %v658_v37  ;;  %v1872_v23 = vld [vmem:[%s2361_s10 + $0x20] sm:$0xf]  ;;  %v1867_v26 = vld [vmem:[%s2361_s10 + $0xc] sm:$0x1]  ;;  %v1145_v27 = vshrl.u32 %v1917_v17, 16  ;;  %v762_v33 = vshll.u32 %v1869_v19, 16  ;;  %v745_v41 = vor.u32 %v744_v20, %v741_v16 }
  0x6f   : > { %v1881_v24 = vld [vmem:[%s2361_s10 + $0x60] sm:$0xf]  ;;  %v1880_v30 = vld [vmem:[%s2361_s10 + $0x58] sm:$0xf]  ;;  %v1863_v31 = vld [vmem:[%s2361_s10 + $0x50] sm:$0xf] }
  0x70   : > { %607 = vrot.lane.b32.xlu0 %v599_v60, %s2259_s8  ;;  %v1104_v60 = vrot.slane %v1102_v45, 5  ;;  %844 = vst.msk [vmem:[#allocation2 + $0x2c] sm:$0xf] %vm209_vm3, %v1881_v24  ;;  %v1870_v34 = vld [vmem:[%s2361_s10 + $0x18] sm:$0xf]  ;;  %v1161_v37 = vrot.slane %v1159_v21, 4 }
  0x71   : > { %843 = vst.msk [vmem:[#allocation2 + $0x28] sm:$0xf] %vm209_vm3, %v1880_v30  ;;  %v1862_v35 = vld [vmem:[%s2361_s10 + $0x48] sm:$0xf]  ;;  %v1920_v36 = vld [vmem:[%s2361_s10 + $0x54] sm:$0x1] }
  0x72   : > { %1046 = vrot.lane.b32.xlu1 %v1908_v61, %s2256_s21  ;;  %v645_v61 = vsel %vm2380_vm2, %v640_v48, %v644_v44  ;;  %v1105_v10 = vsel %vm2380_vm2, %v1100_v62, %v1104_v60  ;;  %v1164_v38 = vrot.slane %v1162_v22, 5  ;;  %v784_v40 = vshll.u32 %v1872_v23, 16  ;;  %v1918_v43 = vld [vmem:[%s2361_s10 + $0x4c] sm:$0x1]  ;;  %v1865_v51 = vld [vmem:[%s2361_s10 + $0x60] sm:$0xf] }
  0x73   : > { %v748_v42 = vshll.u32 %v1867_v26, 16  ;;  %v1147_v44 = vrot.slane %v1145_v27, 4  ;;  %v767_v46 = vshrl.u32 %v1870_v34, 16  ;;  %v760_v48 = vrot.slane %v759_v32, 4  ;;  %v1873_v53 = vld [vmem:[%s2361_s10 + $0x24] sm:$0x1] }
  0x74   : > { %1044 = vrot.lane.b32.xlu0 %v1907_v4, %s2256_s21  ;;  %v1119_v4 = vsel %vm2380_vm2, %v1114_v55, %v1118_v52  ;;  %v764_v49 = vrot.slane %v762_v33, 5  ;;  %v1168_v50 = vshll.u32 %v1920_v36, 16  ;;  %v1165_v52 = vor.u32 %v1164_v38, %v1161_v37  ;;  %v1923_v59 = vld [vmem:[%s2361_s10 + $0x60] sm:$0xf]  ;;  %v1864_v60 = vld [vmem:[%s2361_s10 + $0x58] sm:$0xf] }
  0x75   : > { %v786_v55 = vrot.slane %v784_v40, 5  ;;  %v746_v56 = vrot.slane %v745_v41, 4  ;;  %v750_v57 = vrot.slane %v748_v42, 5  ;;  %v1154_v58 = vshll.u32 %v1918_v43, 16  ;;  %v1871_v62 = vld [vmem:[%s2361_s10 + $0x1c] sm:$0x1] }
  0x76   : > { %1122 = vrot.lane.b32.xlu1 %v1091_v18, %s2257_s5  ;;  %v687_v18 = vsel %vm2380_vm2, %v682_v5, %v686_v6  ;;  %v769_v63 = vrot.slane %v767_v46, 4  ;;  %v765_v1 = vsel %vm2380_vm2, %v760_v48, %v764_v49  ;;  %v1170_v2 = vrot.slane %v1168_v50, 5  ;;  %s2261_s21 = smov 28   ;;  %v1924_v24 = vld [vmem:[%s2361_s10 + $0x64] sm:$0x1] }
  0x77   : > { %v790_v3 = vshll.u32 %v1873_v53, 16  ;;  %v1166_v5 = vrot.slane %v1165_v52, 4  ;;  %v1187_v7 = vshrl.u32 %v1923_v59, 16  ;;  %v1190_v8 = vshll.u32 %v1923_v59, 16  ;;  %v1922_v32 = vld [vmem:[%s2361_s10 + $0x5c] sm:$0x1] }
  0x78   : > { %1120 = vrot.lane.b32.xlu0 %v1077_v29, %s2257_s5  ;;  %v1148_v29 = vshll.u32 %v1917_v17, 16  ;;  %v751_v9 = vsel %vm2380_vm2, %v746_v56, %v750_v57  ;;  %v776_v11 = vshll.u32 %v1871_v62, 16  ;;  %v1182_v38 = vshll.u32 %v1922_v32, 16  ;;  %v1875_v40 = vld [vmem:[%s2361_s10 + $0x10] sm:$0xf] }
  0x79   : > { %v1171_v19 = vsel %vm2380_vm2, %v1166_v5, %v1170_v2  ;;  %v1189_v21 = vrot.slane %v1187_v7, 4  ;;  %v1192_v22 = vrot.slane %v1190_v8, 5  ;;  %v1929_v48 = vld [vmem:[%s2361_s10 + $0x8] sm:$0xf]  ;;  %v1935_v53 = vld [vmem:[%s2361_s10 + $0x20] sm:$0xf] }
  0x7a   : > { %613 = vrot.lane.b32.xlu1 %v602_v39, %s2259_s8  ;;  %v781_v39 = vshrl.u32 %v1872_v23, 16  ;;  %v1150_v45 = vrot.slane %v1148_v29, 5  ;;  %v778_v23 = vrot.slane %v776_v11, 5  ;;  %v1250_v56 = vshrl.u32 %v1929_v48, 16  ;;  %v1926_v62 = vld [vmem:[%s2361_s10 + $0x50] sm:$0xf] }
  0x7b   : > { %v1253_v57 = vshll.u32 %v1929_v48, 16  ;;  %v1292_v59 = vshrl.u32 %v1935_v53, 16  ;;  %v1925_v5 = vld [vmem:[%s2361_s10 + $0x48] sm:$0xf]  ;;  %v1930_v8 = vld [vmem:[%s2361_s10 + $0xc] sm:$0x1] }
  0x7c   : > { %611 = vrot.lane.b32.xlu0 %v601_v47, %s2259_s8  ;;  %v770_v47 = vshll.u32 %v1870_v34, 16  ;;  %v1193_v34 = vor.u32 %v1192_v22, %v1189_v21  ;;  %v1877_v11 = vld [vmem:[%s2361_s10 + $0x20] sm:$0xf]  ;;  %v1934_v21 = vld [vmem:[%s2361_s10 + $0x1c] sm:$0x1] }
  0x7d   : > { %v1255_v7 = vrot.slane %v1253_v57, 5  ;;  %v1943_v32 = vld [vmem:[%s2361_s10 + $0x58] sm:$0xf]  ;;  %v1952_v28 = vld [vmem:[%s2361_s10 + $0x68] sm:$0xf] }
  0x7e   : > { %690 = vrot.lane.b32.xlu1 %v659_v54, %s2260_s9  ;;  %v783_v54 = vrot.slane %v781_v39, 4  ;;  %v772_v0 = vrot.slane %v770_v47, 5  ;;  %v1194_v41 = vrot.slane %v1193_v34, 4  ;;  %v1184_v47 = vrot.slane %v1182_v38, 5 }
  0x80   : > { %688 = vrot.lane.b32.xlu0 %v645_v61, %s2260_s9  ;;  %v1151_v61 = vor.u32 %v1150_v45, %v1147_v44  ;;  %v787_v6 = vor.u32 %v786_v55, %v783_v54  ;;  %v773_v15 = vor.u32 %v772_v0, %v769_v63  ;;  %v1931_v44 = vld [vmem:[%s2361_s10 + $0x10] sm:$0xf]  ;;  %v1874_v45 = vld [vmem:[%s2361_s10 + $0x8] sm:$0xf] }
  0x81   : > { %v1267_v52 = vshll.u32 %v1931_v44, 16 }
  0x82   : > { %1126 = vrot.lane.b32.xlu1 %v1119_v4, %s2257_s5  ;;  %v1921_v4 = vld [vmem:[%s2361_s10 + $0x58] sm:$0xf]  ;;  %v1152_v14 = vrot.slane %v1151_v61, 4  ;;  %v788_v20 = vrot.slane %v787_v6, 4  ;;  %v774_v27 = vrot.slane %v773_v15, 4  ;;  %v1252_v6 = vrot.slane %v1250_v56, 4 }
  0x83   : > { %v1173_v16 = vshrl.u32 %v1921_v4, 16  ;;  %v1176_v17 = vshll.u32 %v1921_v4, 16  ;;  %v1269_v0 = vrot.slane %v1267_v52, 5  ;;  %v1945_v52 = vld [vmem:[%s2361_s10 + $0x60] sm:$0xf] }
  0x84   : > { %1124 = vrot.lane.b32.xlu0 %v1105_v10, %s2257_s5  ;;  %v1156_v10 = vrot.slane %v1154_v58, 5  ;;  %v779_v36 = vsel %vm2380_vm2, %v774_v27, %v778_v23  ;;  %v1933_v58 = vld [vmem:[%s2361_s10 + $0x18] sm:$0xf] }
  0x85   : > { %v1175_v29 = vrot.slane %v1173_v16, 4  ;;  %v1178_v30 = vrot.slane %v1176_v17, 5  ;;  %v1278_v2 = vshrl.u32 %v1933_v58, 16 }
  0x86   : > { %694 = vrot.lane.b32.xlu1 %v687_v18, %s2260_s9  ;;  %v792_v18 = vrot.slane %v790_v3, 5  ;;  %v1281_v3 = vshll.u32 %v1933_v58, 16 }
  0x87   : > { %v1179_v37 = vor.u32 %v1178_v30, %v1175_v29  ;;  %v1280_v16 = vrot.slane %v1278_v2, 4  ;;  %v1938_v2 = vld [vmem:[%s2361_s10 + $0x10] sm:$0xf] }
  0x88   : > { %692 = vrot.lane.b32.xlu0 %v673_v25, %s2260_s9  ;;  %v1157_v25 = vsel %vm2380_vm2, %v1152_v14, %v1156_v10  ;;  %v793_v33 = vsel %vm2380_vm2, %v788_v20, %v792_v18  ;;  %v1936_v14 = vld [vmem:[%s2361_s10 + $0x24] sm:$0x1]  ;;  %v1283_v17 = vrot.slane %v1281_v3, 5  ;;  %v1876_v18 = vld [vmem:[%s2361_s10 + $0x18] sm:$0xf]  ;;  %v1259_v20 = vshll.u32 %v1930_v8, 16 }
  0x89   : > { %v1180_v46 = vrot.slane %v1179_v37, 4  ;;  %v1948_v8 = vld [vmem:[%s2361_s10 + $0x6c] sm:$0x1] }
  0x8a   : > { %715 = vrot.lane.b32.xlu1 %v1863_v31, %s2254_s20  ;;  %v1284_v30 = vor.u32 %v1283_v17, %v1280_v16  ;;  %v1940_v16 = vld [vmem:[%s2361_s10 + $0x20] sm:$0xf] }
  0x8b   : > { %v1185_v55 = vsel %vm2380_vm2, %v1180_v46, %v1184_v47  ;;  %v1947_v46 = vld [vmem:[%s2361_s10 + $0x68] sm:$0xf] }
  0x8c   : > { %713 = vrot.lane.b32.xlu0 %v1862_v35, %s2254_s20  ;;  %v1196_v35 = vshll.u32 %v1924_v24, 16  ;;  %v1301_v24 = vshll.u32 %v1936_v14, 16  ;;  %v1399_v56 = vshll.u32 %v1947_v46, 16 }
  0x8e   : > { %719 = vrot.lane.b32.xlu1 %v1865_v51, %s2254_s20  ;;  %v1198_v42 = vrot.slane %v1196_v35, 5  ;;  %v1264_v51 = vshrl.u32 %v1931_v44, 16  ;;  %v1261_v35 = vrot.slane %v1259_v20, 5  ;;  %v1303_v38 = vrot.slane %v1301_v24, 5 }
  0x8f   : > { %v1285_v44 = vrot.slane %v1284_v30, 4  ;;  %v1405_v20 = vshll.u32 %v1948_v8, 16 }
  0x90   : > { %717 = vrot.lane.b32.xlu0 %v1864_v60, %s2254_s20  ;;  %v1199_v50 = vsel %vm2380_vm2, %v1194_v41, %v1198_v42  ;;  %v1295_v60 = vshll.u32 %v1935_v53, 16  ;;  %v1266_v63 = vrot.slane %v1264_v51, 4  ;;  %v1368_v41 = vshrl.u32 %v1943_v32, 16 }
  0x91   : > { %v2638_v12 = vpop.permute.xlu1 %311  ;;  %v310_v13 = vpop.permute.xlu0 %309  ;;  %v1371_v42 = vshll.u32 %v1943_v32, 16  ;;  %v1407_v32 = vrot.slane %v1405_v20, 5 }
  0x92   : > { %796 = vrot.lane.b32.xlu1 %v765_v1, %s2261_s21  ;;  %v1932_v1 = vld [vmem:[%s2361_s10 + $0x14] sm:$0x1]  ;;  %v1297_v10 = vrot.slane %v1295_v60, 5  ;;  %v1370_v53 = vrot.slane %v1368_v41, 4 }
  0x94   : > { %794 = vrot.lane.b32.xlu0 %v751_v9, %s2261_s21  ;;  %v1294_v9 = vrot.slane %v1292_v59, 4  ;;  %v1944_v59 = vld [vmem:[%s2361_s10 + $0x5c] sm:$0x1] }
  0x95   : > { %v316_v26 = vpop.permute.xlu1 %315  ;;  %v314_v31 = vpop.permute.xlu0 %313 }
  0x96   : > { %1202 = vrot.lane.b32.xlu1 %v1171_v19, %s2258_s11  ;;  %v1256_v19 = vor.u32 %v1255_v7, %v1252_v6  ;;  %v1298_v23 = vor.u32 %v1297_v10, %v1294_v9  ;;  %v1401_v6 = vrot.slane %v1399_v56, 5  ;;  %v1937_v9 = vld [vmem:[%s2361_s10 + $0x8] sm:$0xf] }
  0x98   : > { %1200 = vrot.lane.b32.xlu0 %v1157_v25, %s2258_s11  ;;  %v1928_v25 = vld [vmem:[%s2361_s10 + $0x60] sm:$0xf]  ;;  %v1257_v34 = vrot.slane %v1256_v19, 4  ;;  %v1299_v37 = vrot.slane %v1298_v23, 4 }
  0x9a   : > { %800 = vrot.lane.b32.xlu1 %v793_v33, %s2261_s21  ;;  %v1927_v33 = vld [vmem:[%s2361_s10 + $0x58] sm:$0xf]  ;;  %v1262_v47 = vsel %vm2380_vm2, %v1257_v34, %v1261_v35  ;;  %v1304_v51 = vsel %vm2380_vm2, %v1299_v37, %v1303_v38 }
  0x9b   : > { %v286_v39 = vpop.permute.xlu1 %285 }
  0x9c   : > { %798 = vrot.lane.b32.xlu0 %v779_v36, %s2261_s21  ;;  %296 = vst.msk [vmem:[#allocation2 + $0x8] sm:$0xf] %vm293_vm4, %v286_v39  ;;  %v282_v43 = vpop.permute.xlu0 %281  ;;  %v1941_v39 = vld [vmem:[%s2361_s10 + $0x50] sm:$0xf] }
  0x9d   : > { %294 = vst.msk [vmem:[#allocation2] sm:$0xf] %vm293_vm4, %v282_v43  ;;  %v1354_v48 = vshrl.u32 %v1941_v39, 16 }
  0x9e   : > { %324 = vst.msk [vmem:[#allocation2 + $0x8] sm:$0xf] %vm321_vm5, %v314_v31  ;;  %821 = vrot.lane.b32.xlu1 %v1875_v40, %s2255_s29  ;;  %322 = vst.msk [vmem:[#allocation2] sm:$0xf] %vm321_vm5, %v310_v13  ;;  %v1273_v13 = vshll.u32 %v1932_v1, 16  ;;  %v1287_v31 = vshll.u32 %v1934_v21, 16 }
  0x9f   : > { %v288_v49 = vpop.permute.xlu1 %287  ;;  %v1356_v60 = vrot.slane %v1354_v48, 4  ;;  %v1942_v1 = vld [vmem:[%s2361_s10 + $0x54] sm:$0x1]  ;;  %v1951_v48 = vld [vmem:[%s2361_s10 + $0x60] sm:$0xf] }
  0xa0   : > { %819 = vrot.lane.b32.xlu0 %v1874_v45, %s2255_s29  ;;  %297 = vst.msk [vmem:[#allocation2 + $0xc] sm:$0xf] %vm293_vm4, %v288_v49  ;;  %v284_v54 = vpop.permute.xlu0 %283  ;;  %v1275_v27 = vrot.slane %v1273_v13, 5  ;;  %v1289_v45 = vrot.slane %v1287_v31, 5  ;;  %v1357_v49 = vshll.u32 %v1941_v39, 16 }
  0xa1   : > { %295 = vst.msk [vmem:[#allocation2 + $0x4] sm:$0xf] %vm293_vm4, %v284_v54  ;;  %v1373_v54 = vrot.slane %v1371_v42, 5 }
  0xa2   : > { %325 = vst.msk [vmem:[#allocation2 + $0xc] sm:$0xf] %vm321_vm5, %v316_v26  ;;  %1206 = vrot.lane.b32.xlu1 %v1199_v50, %s2258_s11  ;;  %323 = vst.msk [vmem:[#allocation2 + $0x4] sm:$0xf] %vm321_vm5, %v2638_v12  ;;  %v1270_v12 = vor.u32 %v1269_v0, %v1266_v63  ;;  %v1290_v58 = vsel %vm2380_vm2, %v1285_v44, %v1289_v45  ;;  %v1385_v63 = vshll.u32 %v1945_v52, 16 }
  0xa3   : > { %v393_v61 = vpop.permute.xlu1 %392  ;;  %v1374_v3 = vor.u32 %v1373_v54, %v1370_v53  ;;  %v1949_v45 = vld [vmem:[%s2361_s10 + $0x50] sm:$0xf] }
  0xa4   : > { %1204 = vrot.lane.b32.xlu0 %v1185_v55, %s2258_s11  ;;  %404 = vst.msk [vmem:[#allocation2 + $0x4] sm:$0xf] %vm402_vm6, %v393_v61  ;;  %v1271_v26 = vrot.slane %v1270_v12, 4  ;;  %v1396_v55 = vshrl.u32 %v1947_v46, 16  ;;  %v1359_v61 = vrot.slane %v1357_v49, 5  ;;  %v1387_v13 = vrot.slane %v1385_v63, 5 }
  0xa5   : > { %v391_v4 = vpop.permute.xlu0 %390  ;;  %v1375_v17 = vrot.slane %v1374_v3, 4 }
  0xa6   : > { %403 = vst.msk [vmem:[#allocation2] sm:$0xf] %vm402_vm6, %v391_v4  ;;  %1227 = vrot.lane.b32.xlu1 %v1926_v62, %s2259_s8  ;;  %v1276_v40 = vsel %vm2380_vm2, %v1271_v26, %v1275_v27  ;;  %v1382_v62 = vshrl.u32 %v1945_v52, 16  ;;  %v1377_v4 = vshll.u32 %v1944_v59, 16  ;;  %v1360_v10 = vor.u32 %v1359_v61, %v1356_v60 }
  0xa8   : > { %1225 = vrot.lane.b32.xlu0 %v1925_v5, %s2259_s8  ;;  %v397_v15 = vpop.permute.xlu1 %396  ;;  %v1398_v5 = vrot.slane %v1396_v55, 4  ;;  %v1384_v12 = vrot.slane %v1382_v62, 4  ;;  %v1361_v23 = vrot.slane %v1360_v10, 4 }
  0xa9   : > { %406 = vst.msk [vmem:[#allocation2 + $0xc] sm:$0xf] %vm402_vm6, %v397_v15  ;;  %v1946_v15 = vld [vmem:[%s2361_s10 + $0x64] sm:$0x1] }
  0xaa   : > { %v395_v22 = vpop.permute.xlu0 %394  ;;  %825 = vrot.lane.b32.xlu1 %v1877_v11, %s2255_s29  ;;  %v1363_v11 = vshll.u32 %v1942_v1, 16  ;;  %v1402_v19 = vor.u32 %v1401_v6, %v1398_v5  ;;  %v1391_v26 = vshll.u32 %v1946_v15, 16 }
  0xab   : > { %405 = vst.msk [vmem:[#allocation2 + $0x8] sm:$0xf] %vm402_vm6, %v395_v22  ;;  %v1939_v22 = vld [vmem:[%s2361_s10 + $0x18] sm:$0xf] }
  0xac   : > { %823 = vrot.lane.b32.xlu0 %v1876_v18, %s2255_s29  ;;  %v422_v29 = vpop.permute.xlu1 %421  ;;  %v1379_v18 = vrot.slane %v1377_v4, 5  ;;  %v1365_v24 = vrot.slane %v1363_v11, 5  ;;  %v1403_v31 = vrot.slane %v1402_v19, 4 }
  0xad   : > { %433 = vst.msk [vmem:[#allocation2 + $0x4] sm:$0xf] %vm431_vm7, %v422_v29 }
  0xae   : > { %v420_v36 = vpop.permute.xlu0 %419  ;;  %1231 = vrot.lane.b32.xlu1 %v1928_v25, %s2259_s8  ;;  %v1388_v25 = vor.u32 %v1387_v13, %v1384_v12  ;;  %v1380_v30 = vsel %vm2380_vm2, %v1375_v17, %v1379_v18  ;;  %v1366_v34 = vsel %vm2380_vm2, %v1361_v23, %v1365_v24  ;;  %v1408_v38 = vsel %vm2380_vm2, %v1403_v31, %v1407_v32 }
  0xaf   : > { %432 = vst.msk [vmem:[#allocation2] sm:$0xf] %vm431_vm7, %v420_v36  ;;  %v1393_v36 = vrot.slane %v1391_v26, 5 }
  0xb0   : > { %1229 = vrot.lane.b32.xlu0 %v1927_v33, %s2259_s8  ;;  %v426_v43 = vpop.permute.xlu1 %425  ;;  %v1389_v35 = vrot.slane %v1388_v25, 4  ;;  %s2836_s8 = scalar_lea.hbm %s2896_s3, %s1973_s7 }
  0xb1   : > { %435 = vst.msk [vmem:[#allocation2 + $0xc] sm:$0xf] %vm431_vm7, %v426_v43  ;;  %v1950_v43 = vld [vmem:[%s2361_s10 + $0x58] sm:$0xf]  ;;  %s175_s10 = sand.u32 1, %s2226_s13  }
  0xb2   : > { %v424_v50 = vpop.permute.xlu0 %423  ;;  %1307 = vrot.lane.b32.xlu1 %v1276_v40, %s2260_s9  ;;  %v1394_v40 = vsel %vm2380_vm2, %v1389_v35, %v1393_v36  ;;  %s1821_s24 = sshll.u32 %s175_s10, 4 }
  0xb3   : > { %434 = vst.msk [vmem:[#allocation2 + $0x8] sm:$0xf] %vm431_vm7, %v424_v50  ;;  %s177_s5 = scalar_lea.vmem [#allocation3], %s1821_s24 }
  0xb4   : > { %1305 = vrot.lane.b32.xlu0 %v1262_v47, %s2260_s9  ;;  %v503_v57 = vpop.permute.xlu1 %502  ;;  %s1725_s6 = sshll.u32 %s177_s5, 4  ;;  %s2831_s6 = int_to_ptr.vmem [resolvable:$true] %s1725_s6 }
  0xb5   : > { %514 = vst.msk [vmem:[#allocation2 + $0x4] sm:$0xf] %vm512_vm8, %v503_v57 }
  0xb6   : > { %v501_v0 = vpop.permute.xlu0 %500  ;;  %1311 = vrot.lane.b32.xlu1 %v1304_v51, %s2260_s9 }
  0xb7   : > { %513 = vst.msk [vmem:[#allocation2] sm:$0xf] %vm512_vm8, %v501_v0 }
  0xb8   : > { %1309 = vrot.lane.b32.xlu0 %v1290_v58, %s2260_s9  ;;  %v912_v7 = vpop.permute.xlu1 %911  ;;  %s2840_s9 = scalar_lea.sflag [#allocation4], %s175_s10 }
  0xb9   : > { %922 = vst.msk [vmem:[#allocation2 + $0x24] sm:$0xf] %vm293_vm4, %v912_v7 }
  0xba   : > { %v910_v14 = vpop.permute.xlu0 %909  ;;  %1331 = vrot.lane.b32.xlu1 %v1938_v2, %s2254_s20 }
  0xbb   : > { %921 = vst.msk [vmem:[#allocation2 + $0x20] sm:$0xf] %vm293_vm4, %v910_v14 }
  0xbc   : > { %1329 = vrot.lane.b32.xlu0 %v1937_v9, %s2254_s20  ;;  %v507_v21 = vpop.permute.xlu1 %506 }
  0xbd   : > { %516 = vst.msk [vmem:[#allocation2 + $0xc] sm:$0xf] %vm512_vm8, %v507_v21 }
  0xbe   : > { %v505_v27 = vpop.permute.xlu0 %504  ;;  %1335 = vrot.lane.b32.xlu1 %v1940_v16, %s2254_s20  ;;  %v2147_v29 = vld [vmem:[#allocation2] sm:$0xff]  }
  0xbf   : > { %515 = vst.msk [vmem:[#allocation2 + $0x8] sm:$0xf] %vm512_vm8, %v505_v27  ;;  %2025 = vmatprep.mubr.bf16.mxu0 %v2147_v29 }
  0xc0   : > { %1333 = vrot.lane.b32.xlu0 %v1939_v22, %s2254_s20  ;;  %v916_v33 = vpop.permute.xlu1 %915  ;;  %s2262_s20 = smov [#allocation3]  }
  0xc1   : > { %924 = vst.msk [vmem:[#allocation2 + $0x2c] sm:$0xf] %vm293_vm4, %v916_v33 }
  0xc2   : > { %v914_v37 = vpop.permute.xlu0 %913  ;;  %1411 = vrot.lane.b32.xlu1 %v1380_v30, %s2261_s21 }
  0xc3   : > { %923 = vst.msk [vmem:[#allocation2 + $0x28] sm:$0xf] %vm293_vm4, %v914_v37 }
  0xc4   : > { %1409 = vrot.lane.b32.xlu0 %v1366_v34, %s2261_s21  ;;  %v936_v39 = vpop.permute.xlu1 %935 }
  0xc5   : > { %946 = vst.msk [vmem:[#allocation2 + $0x24] sm:$0xf] %vm321_vm5, %v936_v39 }
  0xc6   : > { %v934_v41 = vpop.permute.xlu0 %933  ;;  %1415 = vrot.lane.b32.xlu1 %v1408_v38, %s2261_s21  ;;  %v2149_v42 = vld [vmem:[#allocation2 + $0x8] sm:$0xff]  }
  0xc7   : > { %945 = vst.msk [vmem:[#allocation2 + $0x20] sm:$0xf] %vm321_vm5, %v934_v41  ;;  %2026 = vmatmul.mubr.bf16.vlgmr.msra.gmra.mrb[0].mxu0 %v2149_v42 }
  0xc8   : > { %1413 = vrot.lane.b32.xlu0 %v1394_v40, %s2261_s21  ;;  %v940_v44 = vpop.permute.xlu1 %939  ;;  %s2156_s21 = scalar_lea.vmem %s2831_s6, 256 }
  0xc9   : > { %948 = vst.msk [vmem:[#allocation2 + $0x2c] sm:$0xf] %vm321_vm5, %v940_v44  ;;  %p2157_p13 = scmp.ne.s32.totalorder %s2831_s6, %s2156_s21 }
  0xca   : > { %v938_v46 = vpop.permute.xlu0 %937  ;;  %1435 = vrot.lane.b32.xlu1 %v1950_v43, %s2255_s29 }
  0xcb   : > { %947 = vst.msk [vmem:[#allocation2 + $0x28] sm:$0xf] %vm321_vm5, %v938_v46  ;;  %p2158_p0 = pnand %p2157_p13, %p2335_p3 }
  0xcc   : > { %1433 = vrot.lane.b32.xlu0 %v1949_v45, %s2255_s29  ;;  %v1016_v47 = vpop.permute.xlu1 %1015 }
  0xcd   : > { %1026 = vst.msk [vmem:[#allocation2 + $0x24] sm:$0xf] %vm402_vm6, %v1016_v47  ;;  %p2159_p1 = pneg %p2158_p0 }
  0xce   : > { %v1014_v49 = vpop.permute.xlu0 %1013  ;;  %1439 = vrot.lane.b32.xlu1 %v1952_v28, %s2255_s29 }
  0xcf   : > { %1025 = vst.msk [vmem:[#allocation2 + $0x20] sm:$0xf] %vm402_vm6, %v1014_v49 }
  0xd0   : > { %1437 = vrot.lane.b32.xlu0 %v1951_v48, %s2255_s29  ;;  %v584_v50 = vpop.permute.xlu1 %583  ;;  %s2160_s29 = sshll.u32 %s2262_s20, 4  ;;  %s2161_s29 = int_to_ptr.vmem [resolvable:$false] %s2160_s29 }
  0xd1   : > { %596 = vst.msk [vmem:[#allocation2 + $0x14] sm:$0xf] %vm594_vm9, %v584_v50  ;;  %s2162_s24 = scalar_lea.vmem %s2161_s29, 512  ;;  %p2163_p2 = scmp.lt.s32.totalorder %s2831_s6, %s2161_s29 }
  0xd2   : > { %v582_v51 = vpop.permute.xlu0 %581  ;;  %p2164_p4 = scmp.lt.s32.totalorder %s2162_s24, %s2156_s21 }
  0xd3   : > { %595 = vst.msk [vmem:[#allocation2 + $0x10] sm:$0xf] %vm594_vm9, %v582_v51 }
  0xd4   : > { %v1020_v52 = vpop.permute.xlu1 %1019  ;;  %p2165_p5 = por %p2164_p4, %p2163_p2 }
  0xd5   : > { %1028 = vst.msk [vmem:[#allocation2 + $0x2c] sm:$0xf] %vm402_vm6, %v1020_v52 }
  0xd6   : > { %v1018_v53 = vpop.permute.xlu0 %1017  ;;  %p2166_p6 = pnand %p2165_p5, %p2159_p1 }
  0xd7   : > { %1027 = vst.msk [vmem:[#allocation2 + $0x28] sm:$0xf] %vm402_vm6, %v1018_v53 }
  0xd8   : > { %v1043_v54 = vpop.permute.xlu1 %1042 }
  0xd9   : > { %1053 = vst.msk [vmem:[#allocation2 + $0x24] sm:$0xf] %vm431_vm7, %v1043_v54 }
  0xda   : > { %v1041_v55 = vpop.permute.xlu0 %1040 }
  0xdb   : > { %1052 = vst.msk [vmem:[#allocation2 + $0x20] sm:$0xf] %vm431_vm7, %v1041_v55 }
  0xdc   : > { %v588_v56 = vpop.permute.xlu1 %587 }
  0xdd   : > { %598 = vst.msk [vmem:[#allocation2 + $0x1c] sm:$0xf] %vm594_vm9, %v588_v56 }
  0xde   : > { %v586_v57 = vpop.permute.xlu0 %585 }
  0xdf   : > { %597 = vst.msk [vmem:[#allocation2 + $0x18] sm:$0xf] %vm594_vm9, %v586_v57 }
  0xe0   : > { %v610_v58 = vpop.permute.xlu1 %609 }
  0xe1   : > { %621 = vst.msk [vmem:[#allocation2 + $0x14] sm:$0xf] %vm619_vm10, %v610_v58 }
  0xe2   : > { %v608_v59 = vpop.permute.xlu0 %607 }
  0xe3   : > { %620 = vst.msk [vmem:[#allocation2 + $0x10] sm:$0xf] %vm619_vm10, %v608_v59 }
  0xe4   : > { %v1047_v60 = vpop.permute.xlu1 %1046 }
  0xe5   : > { %1055 = vst.msk [vmem:[#allocation2 + $0x2c] sm:$0xf] %vm431_vm7, %v1047_v60 }
  0xe6   : > { %v1045_v61 = vpop.permute.xlu0 %1044 }
  0xe7   : > { %1054 = vst.msk [vmem:[#allocation2 + $0x28] sm:$0xf] %vm431_vm7, %v1045_v61 }
  0xe8   : > { %v1123_v62 = vpop.permute.xlu1 %1122 }
  0xe9   : > { %1133 = vst.msk [vmem:[#allocation2 + $0x24] sm:$0xf] %vm512_vm8, %v1123_v62 }
  0xea   : > { %v1121_v63 = vpop.permute.xlu0 %1120 }
  0xeb   : > { %1132 = vst.msk [vmem:[#allocation2 + $0x20] sm:$0xf] %vm512_vm8, %v1121_v63 }
  0xec   : > { %v614_v0 = vpop.permute.xlu1 %613 }
  0xed   : > { %623 = vst.msk [vmem:[#allocation2 + $0x1c] sm:$0xf] %vm619_vm10, %v614_v0 }
  0xee   : > { %v612_v1 = vpop.permute.xlu0 %611 }
  0xef   : > { %622 = vst.msk [vmem:[#allocation2 + $0x18] sm:$0xf] %vm619_vm10, %v612_v1 }
  0xf0   : > { %v691_v2 = vpop.permute.xlu1 %690 }
  0xf1   : > { %702 = vst.msk [vmem:[#allocation2 + $0x14] sm:$0xf] %vm700_vm11, %v691_v2 }
  0xf2   : > { %v689_v3 = vpop.permute.xlu0 %688  ;;  %v2150_v4 = vld [vmem:[#allocation2 + $0x20] sm:$0xff]  }
  0xf3   : > { %701 = vst.msk [vmem:[#allocation2 + $0x10] sm:$0xf] %vm700_vm11, %v689_v3  ;;  %2033 = vmatprep.mubr.bf16.mxu1 %v2150_v4 }
  0xf4   : > { %v1127_v5 = vpop.permute.xlu1 %1126 }
  0xf5   : > { %1135 = vst.msk [vmem:[#allocation2 + $0x2c] sm:$0xf] %vm512_vm8, %v1127_v5 }
  0xf6   : > { %v1125_v6 = vpop.permute.xlu0 %1124 }
  0xf7   : > { %1134 = vst.msk [vmem:[#allocation2 + $0x28] sm:$0xf] %vm512_vm8, %v1125_v6 }
  0xf8   : > { %v695_v7 = vpop.permute.xlu1 %694 }
  0xf9   : > { %704 = vst.msk [vmem:[#allocation2 + $0x1c] sm:$0xf] %vm700_vm11, %v695_v7  ;;  %v1969_v7 = vld [vmem:[%s2895_s2] ss:$0 sm:$0xff] }
  0xfa   : > { %v693_v8 = vpop.permute.xlu0 %692 }
  0xfb   : > { %703 = vst.msk [vmem:[#allocation2 + $0x18] sm:$0xf] %vm700_vm11, %v693_v8 }
  0xfc   : > { %v716_v9 = vpop.permute.xlu1 %715 }
  0xfd   : > { %727 = vst.msk [vmem:[#allocation2 + $0x14] sm:$0xf] %vm725_vm12, %v716_v9 }
  0xfe   : > { %v714_v10 = vpop.permute.xlu0 %713  ;;  %v2151_v11 = vld [vmem:[#allocation2 + $0x28] sm:$0xff]  }
  0xff   : > { %726 = vst.msk [vmem:[#allocation2 + $0x10] sm:$0xf] %vm725_vm12, %v714_v10  ;;  %2034 = vmatmul.mubr.bf16.vlgmr.msra.gmra.mrb[0].mxu1 %v2151_v11 }
 0x100   : > { %v720_v12 = vpop.permute.xlu1 %719 }
 0x101   : > { %729 = vst.msk [vmem:[#allocation2 + $0x1c] sm:$0xf] %vm725_vm12, %v720_v12 }
 0x102   : > { %v718_v13 = vpop.permute.xlu0 %717 }
 0x103   : > { %728 = vst.msk [vmem:[#allocation2 + $0x18] sm:$0xf] %vm725_vm12, %v718_v13 }
 0x104   : > { %v797_v14 = vpop.permute.xlu1 %796 }
 0x105   : > { %808 = vst.msk [vmem:[#allocation2 + $0x14] sm:$0xf] %vm806_vm13, %v797_v14 }
 0x106   : > { %v795_v15 = vpop.permute.xlu0 %794 }
 0x107   : > { %807 = vst.msk [vmem:[#allocation2 + $0x10] sm:$0xf] %vm806_vm13, %v795_v15 }
 0x108   : > { %v1203_v16 = vpop.permute.xlu1 %1202 }
 0x109   : > { %1214 = vst.msk [vmem:[#allocation2 + $0x34] sm:$0xf] %vm594_vm9, %v1203_v16 }
 0x10a   : > { %v1201_v17 = vpop.permute.xlu0 %1200 }
 0x10b   : > { %1213 = vst.msk [vmem:[#allocation2 + $0x30] sm:$0xf] %vm594_vm9, %v1201_v17 }
 0x10c   : > { %v801_v18 = vpop.permute.xlu1 %800 }
 0x10d   : > { %810 = vst.msk [vmem:[#allocation2 + $0x1c] sm:$0xf] %vm806_vm13, %v801_v18 }
 0x10e   : > { %v799_v19 = vpop.permute.xlu0 %798 }
 0x10f   : > { %809 = vst.msk [vmem:[#allocation2 + $0x18] sm:$0xf] %vm806_vm13, %v799_v19 }
 0x110   : > { %v822_v20 = vpop.permute.xlu1 %821 }
 0x111   : > { %833 = vst.msk [vmem:[#allocation2 + $0x14] sm:$0xf] %vm831_vm14, %v822_v20 }
 0x112   : > { %v820_v21 = vpop.permute.xlu0 %819 }
 0x113   : > { %832 = vst.msk [vmem:[#allocation2 + $0x10] sm:$0xf] %vm831_vm14, %v820_v21 }
 0x114   : > { %v1207_v22 = vpop.permute.xlu1 %1206 }
 0x115   : > { %1216 = vst.msk [vmem:[#allocation2 + $0x3c] sm:$0xf] %vm594_vm9, %v1207_v22 }
 0x116   : > { %v1205_v23 = vpop.permute.xlu0 %1204 }
 0x117   : > { %1215 = vst.msk [vmem:[#allocation2 + $0x38] sm:$0xf] %vm594_vm9, %v1205_v23 }
 0x118   : > { %v1228_v24 = vpop.permute.xlu1 %1227 }
 0x119   : > { %1238 = vst.msk [vmem:[#allocation2 + $0x34] sm:$0xf] %vm619_vm10, %v1228_v24 }
 0x11a   : > { %v1226_v25 = vpop.permute.xlu0 %1225  ;;  %v2152_v26 = vld [vmem:[#allocation2 + $0x10] sm:$0xff]  }
 0x11b   : > { %1237 = vst.msk [vmem:[#allocation2 + $0x30] sm:$0xf] %vm619_vm10, %v1226_v25  ;;  %2029 = vmatprep.mubr.bf16.mxu0 %v2152_v26 }
 0x11c   : > { %v826_v27 = vpop.permute.xlu1 %825 }
 0x11d   : > { %835 = vst.msk [vmem:[#allocation2 + $0x1c] sm:$0xf] %vm831_vm14, %v826_v27 }
 0x11e   : > { %v824_v29 = vpop.permute.xlu0 %823 }
 0x11f   : > { %834 = vst.msk [vmem:[#allocation2 + $0x18] sm:$0xf] %vm831_vm14, %v824_v29 }
 0x120   : > { %v1232_v30 = vpop.permute.xlu1 %1231 }
 0x121   : > { %1240 = vst.msk [vmem:[#allocation2 + $0x3c] sm:$0xf] %vm619_vm10, %v1232_v30 }
 0x122   : > { %v1230_v31 = vpop.permute.xlu0 %1229 }
 0x123   : > { %1239 = vst.msk [vmem:[#allocation2 + $0x38] sm:$0xf] %vm619_vm10, %v1230_v31 }
 0x124   : > { %v1308_v32 = vpop.permute.xlu1 %1307 }
 0x125   : > { %1318 = vst.msk [vmem:[#allocation2 + $0x34] sm:$0xf] %vm700_vm11, %v1308_v32 }
 0x126   : > { %v1306_v33 = vpop.permute.xlu0 %1305  ;;  %v2153_v34 = vld [vmem:[#allocation2 + $0x18] sm:$0xff]  }
 0x127   : > { %1317 = vst.msk [vmem:[#allocation2 + $0x30] sm:$0xf] %vm700_vm11, %v1306_v33  ;;  %2030 = vmatmul.mubr.bf16.gmra.mrb[4].mxu0 %v2153_v34 }
 0x128   : > { %v1312_v35 = vpop.permute.xlu1 %1311 }
 0x129   : > { %1320 = vst.msk [vmem:[#allocation2 + $0x3c] sm:$0xf] %vm700_vm11, %v1312_v35 }
 0x12a   : > { %v1310_v36 = vpop.permute.xlu0 %1309 }
 0x12b   : > { %1319 = vst.msk [vmem:[#allocation2 + $0x38] sm:$0xf] %vm700_vm11, %v1310_v36 }
 0x12c   : > { %v1332_v37 = vpop.permute.xlu1 %1331 }
 0x12d   : > { %1342 = vst.msk [vmem:[#allocation2 + $0x34] sm:$0xf] %vm725_vm12, %v1332_v37 }
 0x12e   : > { %v1330_v38 = vpop.permute.xlu0 %1329 }
 0x12f   : > { %1341 = vst.msk [vmem:[#allocation2 + $0x30] sm:$0xf] %vm725_vm12, %v1330_v38 }
 0x130   : > { %v1336_v39 = vpop.permute.xlu1 %1335 }
 0x131   : > { %1344 = vst.msk [vmem:[#allocation2 + $0x3c] sm:$0xf] %vm725_vm12, %v1336_v39 }
 0x132   : > { %v1334_v40 = vpop.permute.xlu0 %1333 }
 0x133   : > { %1343 = vst.msk [vmem:[#allocation2 + $0x38] sm:$0xf] %vm725_vm12, %v1334_v40 }
 0x134   : > { %v1412_v41 = vpop.permute.xlu1 %1411 }
 0x135   : > { %1422 = vst.msk [vmem:[#allocation2 + $0x34] sm:$0xf] %vm806_vm13, %v1412_v41 }
 0x136   : > { %v1410_v42 = vpop.permute.xlu0 %1409 }
 0x137   : > { %1421 = vst.msk [vmem:[#allocation2 + $0x30] sm:$0xf] %vm806_vm13, %v1410_v42 }
 0x138   : > { %v1416_v43 = vpop.permute.xlu1 %1415 }
 0x139   : > { %1424 = vst.msk [vmem:[#allocation2 + $0x3c] sm:$0xf] %vm806_vm13, %v1416_v43 }
 0x13a   : > { %v1414_v44 = vpop.permute.xlu0 %1413 }
 0x13b   : > { %1423 = vst.msk [vmem:[#allocation2 + $0x38] sm:$0xf] %vm806_vm13, %v1414_v44 }
 0x13c   : > { %v1436_v45 = vpop.permute.xlu1 %1435 }
 0x13d   : > { %1446 = vst.msk [vmem:[#allocation2 + $0x34] sm:$0xf] %vm831_vm14, %v1436_v45 }
 0x13e   : > { %v1434_v46 = vpop.permute.xlu0 %1433 }
 0x13f   : > { %1445 = vst.msk [vmem:[#allocation2 + $0x30] sm:$0xf] %vm831_vm14, %v1434_v46 }
 0x140   : > { %v1440_v28 = vpop.permute.xlu1 %1439 }
 0x141   : > { %1448 = vst.msk [vmem:[#allocation2 + $0x3c] sm:$0xf] %vm831_vm14, %v1440_v28 }
 0x142   : > { %v1438_v47 = vpop.permute.xlu0 %1437 }
 0x143   : > { %1447 = vst.msk [vmem:[#allocation2 + $0x38] sm:$0xf] %vm831_vm14, %v1438_v47 }
 0x146   : > { %v2154_v48 = vld [vmem:[#allocation2 + $0x30] sm:$0xff]  }
 0x147   : > { %2037 = vmatprep.mubr.bf16.mxu1 %v2154_v48 }
 0x14a   : > { %v2155_v49 = vld [vmem:[#allocation2 + $0x38] sm:$0xff]  }
 0x14b   : > { %2038 = vmatmul.mubr.bf16.gmra.mrb[4].mxu1 %v2155_v49 }
 0x19a   : > { %v2027_v50 = vpop.f32.mrb[0].mxu0 }
 0x19b   : > { %v1611_v51 = vpop.f32.mrb[1].mxu0 }
 0x19c   : > { %v2028_v52 = vpop.f32.mrb[2].mxu0 }
 0x19d   : > { %v1614_v53 = vpop.f32.mrb[3].mxu0 }
 0x1d2   : > { %v2035_v54 = vpop.f32.mrb[0].mxu1 }
 0x1d3   : > { %v1643_v55 = vpop.f32.mrb[1].mxu1 }
 0x1d4   : > { %v2036_v56 = vpop.f32.mrb[2].mxu1 }
 0x1d5   : > { %v1646_v57 = vpop.f32.mrb[3].mxu1 }
 0x1fa   : > { %v2031_v58 = vpop.f32.mrb[4].mxu0 }
 0x1fb   : > { %v1680_v59 = vmax.f32 %v2027_v50, %v2031_v58  ;;  %v1627_v60 = vpop.f32.mrb[5].mxu0 }
 0x1fc   : > { %v1674_v61 = vmax.f32 %v1611_v51, %v1627_v60  ;;  %v2032_v62 = vpop.f32.mrb[6].mxu0 }
 0x1fd   : > { %v1683_v63 = vmax.f32 %v2028_v52, %v2032_v62  ;;  %v1630_v0 = vpop.f32.mrb[7].mxu0  ;;  %v1681_v1 = vmax.f32 %v1680_v59, %v2035_v54 }
 0x1fe   : > { %v1677_v2 = vmax.f32 %v1614_v53, %v1630_v0  ;;  %v1675_v3 = vmax.f32 %v1674_v61, %v1643_v55 }
 0x1ff   : > { %v1684_v4 = vmax.f32 %v1683_v63, %v2036_v56 }
 0x200   : > { %v1678_v5 = vmax.f32 %v1677_v2, %v1646_v57 }
 0x21e   : > { %v2039_v6 = vpop.f32.mrb[4].mxu1 }
 0x21f   : > { %v1682_v8 = vmax.f32 %v1681_v1, %v2039_v6  ;;  %v1659_v9 = vpop.f32.mrb[5].mxu1 }
 0x220   : > { %v1676_v10 = vmax.f32 %v1675_v3, %v1659_v9  ;;  %v2040_v11 = vpop.f32.mrb[6].mxu1 }
 0x221   : > { %v1695_v12 = vadd.f32 %v1969_v7, %v1682_v8  ;;  %v1685_v13 = vmax.f32 %v1684_v4, %v2040_v11  ;;  %v1662_v14 = vpop.f32.mrb[7].mxu1 }
 0x222   : > { %v1693_v15 = vadd.f32 %v1969_v7, %v1676_v10  ;;  %v1679_v16 = vmax.f32 %v1678_v5, %v1662_v14 }
 0x223   : > { %v1696_v17 = vadd.f32 %v1969_v7, %v1685_v13  ;;  %v1699_v19 = vmax.f32 %v1695_v12, 0.0 }
 0x224   : > { %v1694_v18 = vadd.f32 %v1969_v7, %v1679_v16  ;;  %v1697_v21 = vmax.f32 %v1693_v15, 0.0 }
 0x225   : > { %v1700_v20 = vmax.f32 %v1696_v17, 0.0 }
 0x226   : > { %v1698_v22 = vmax.f32 %v1694_v18, 0.0 }
 0x227   : > { %v1990_v23 = vpack.c.bf16 %v1700_v20, %v1699_v19 }
 0x228   : > { %v1985_v24 = vpack.c.bf16 %v1698_v22, %v1697_v21 }
 0x229   : > { %1992 = vst [vmem:[%s177_s5 + $0x8] sm:$0xff] %v1990_v23  }
 0x22a   : > { %1986 = vst [vmem:[%s177_s5] sm:$0xff] %v1985_v24  }
 0x22b   : > { %2169 = shalt.err (!%p2166_p6)
}
 0x22c   : > { %s2170_s10 = scalar_lea.hbm %s2836_s8, 256  ;;  %s2174_s4 = scalar_lea.hbm %s2896_s3, 1024 }
 0x22d   : > { %p2171_p7 = scmp.ne.s32.totalorder %s2836_s8, %s2170_s10  ;;  %p2175_p11 = scmp.lt.u32.totalorder %s2836_s8, %s2896_s3 }
 0x22e   : > { %p2176_p12 = scmp.lt.u32.totalorder %s2174_s4, %s2170_s10  ;;  %p2178_p0 = scmp.lt.u32.totalorder %s2170_s10, %s2836_s8 }
 0x22f   : > { %p2172_p9 = pnand %p2171_p7, %p2335_p3 }
 0x230   : > { %p2177_p13 = por %p2176_p12, %p2175_p11 }
 0x231   : > { %p2173_p10 = pneg %p2172_p9 }
 0x232   : > { %p2179_p1 = por %p2178_p0, %p2177_p13 }
 0x234   : > { %p2180_p2 = pnand %p2179_p1, %p2173_p10 }
 0x236   : > { %2183 = shalt.err (!%p2180_p2)
}
 0x237   : > { %s2263_s15 = smov 64  }
 0x238   : > { %2058 = dma.vmem_to_hbm [thread:$0]  (%p2335_p3), %s2831_s6, 256, %s2836_s8, %s2840_s9, %s2263_s15, %s2263_s15, %s2258_s11  }
 0x239 PF: > { %p2064_p4 = scmp.ge.s32.totalorder %s2250_s19, 2  ;;  %s1740_s16 = sand.u32 1, %s2222_s12  }
 0x23a   : > { %s1741_s21 = scalar_lea.sflag [#allocation4], %s1740_s16 }
 0x23b   : > { %p2061_p5 = pnand %p2064_p4, %p2344_p8 }
 0x23d   : > { %2217 = dma.done.wait (!%p2061_p5), %s1741_s21, 256  }
 0x23e   : > { %2219 = vsyncadd (!%p2061_p5), %s1741_s21, 4294967040  ;;  %s16_s19 = sadd.s32 1, %s2250_s19   ;;  %s2901_s12 = smov %s2226_s13 }
 0x23f   : > { %p13_p6 = scmp.ge.s32.totalorder %s16_s19, 6   ;;  %s2902_s13 = smov %s2230_s14 }
 0x240   : > { %s2903_s14 = smov %s2353_s30  ;;  %s2904_s15 = smov %s2242_s17 }
 0x241   : > { %s2905_s16 = smov %s2246_s18  ;;  %s2906_s17 = smov %s2909_s22 }
 0x242   : > { %s2907_s18 = smov %s2913_s23  ;;  %15 = sbr.rel (!%p13_p6) target bundleno = 5 (0x5), region = 74 }
 0x249   :  { %1746 = vsyncpa [#allocation4], 1 }
 0x24a   :  { %1748 = vsyncpa [#allocation4 + $0x1], 1 }

</bundles_post_ra>
